<compile_context>
chip_gen: v6e
topology: v6e:2x2x1
jax: 0.10.0
libtpu: 0.0.40
codegen_flags: <defaults>
</compile_context>

<pallas_src>
import functools

import jax
import jax.numpy as jnp
from jax import lax
from jax.experimental import pallas as pl
from jax.experimental.pallas import tpu as pltpu

LOWER = 0.0001
UPPER = 1.5
SCALE_FACTOR = 0.5

LANE = 128  # fused head width: mu in [0, latent), logit_sigma in [latent, 2*latent)


def _round_up(x, m):
    return ((x + m - 1) // m) * m


def _pick_batch_tile(B):
    # 128-aligned tiles for the MXU; keep >= 2 grid steps when B allows so the
    # "parallel" batch axis shards across v7x's two TensorCores; grow the tile
    # for large B to amortize the ~0.35 us per-grid-step overhead.
    if B >= 1024:
        return 512
    if B >= 512:
        return 256
    if B >= 128:
        return 128
    return _round_up(max(B, 16), 16)  # bf16 sublane-pack friendly for tiny B


def _encoder_kernel(x_ref, w1_ref, b1_ref, w2_ref, b2_ref,
                    w_head_ref, b_head_ref, out_ref, *, latent_dim):
    # fc1 + relu  (bf16 operands, f32 accumulation, f32 epilogue)
    h1 = jnp.dot(x_ref[...], w1_ref[...], preferred_element_type=jnp.float32)
    h1 = jnp.maximum(h1 + b1_ref[...], 0.0)

    # fc2 + relu
    h2 = jnp.dot(h1.astype(jnp.bfloat16), w2_ref[...],
                 preferred_element_type=jnp.float32)
    h2 = jnp.maximum(h2 + b2_ref[...], 0.0)

    # fused head: one (tb, 128) dot; mu in lanes [0, latent_dim),
    # logit_sigma in lanes [latent_dim, 2*latent_dim), rest is zero padding.
    head = jnp.dot(h2.astype(jnp.bfloat16), w_head_ref[...],
                   preferred_element_type=jnp.float32) + b_head_ref[...]

    # generalized sigmoid on the logit half; EUP reciprocal instead of VPU div.
    sig = LOWER + (UPPER - LOWER) * pl.reciprocal(
        1.0 + jnp.exp(-SCALE_FACTOR * head), approx=True)

    lane = lax.broadcasted_iota(jnp.int32, head.shape, dimension=1)
    # single lane-dense (tb, 128) store: mu lanes keep `head`, the rest get sig
    out_ref[...] = jnp.where(lane < latent_dim, head, sig)


def pack_params(params):
    """One-time packing: bf16 weight casts + fused 128-lane head. Not hot-path."""
    w1, b1, w2, b2, w31, b31, w32, b32 = params
    latent_dim = w31.shape[1]
    hidden2 = w2.shape[1]
    # TODO(synk): support latent_dim > 64 with a multi-tile (>=256 lane) head.
    assert 2 * latent_dim <= LANE, "fused 128-lane head requires latent_dim <= 64"

    w_head = jnp.zeros((hidden2, LANE), jnp.float32)
    w_head = w_head.at[:, :latent_dim].set(w31)
    w_head = w_head.at[:, latent_dim:2 * latent_dim].set(w32)
    b_head = jnp.zeros((1, LANE), jnp.float32)
    b_head = b_head.at[:, :latent_dim].set(b31)
    b_head = b_head.at[:, latent_dim:2 * latent_dim].set(b32)

    # bf16 weights: halves HBM->VMEM DMA, native MXU rate; biases stay f32.
    return (w1.astype(jnp.bfloat16), b1,
            w2.astype(jnp.bfloat16), b2,
            w_head.astype(jnp.bfloat16), b_head)


def encoder_pallas(x, packed, latent_dim):
    """x: (B, input_dim) f32 -> (mu, sigma), each (B, latent_dim) f32."""
    w1_bf, b1, w2_bf, b2, w_head_bf, b_head = packed
    B, input_dim = x.shape
    hidden1 = w1_bf.shape[1]
    hidden2 = w2_bf.shape[1]

    x = x.astype(jnp.bfloat16)  # half-width input DMA, no per-tile cast
    tb = _pick_batch_tile(B)
    Bp = _round_up(B, tb)
    if Bp != B:
        x = jnp.pad(x, ((0, Bp - B), (0, 0)))
    grid = (Bp // tb,)

    const = lambda i: (0, 0)  # weights/biases: same block every step -> no re-DMA
    in_specs = [
        pl.BlockSpec((tb, input_dim), lambda i: (i, 0)),   # x row tiles (bf16)
        pl.BlockSpec((input_dim, hidden1), const),          # w1 (bf16, resident)
        pl.BlockSpec((1, hidden1), const),                   # b1
        pl.BlockSpec((hidden1, hidden2), const),             # w2 (bf16, resident)
        pl.BlockSpec((1, hidden2), const),                   # b2
        pl.BlockSpec((hidden2, LANE), const),                 # fused head weight
        pl.BlockSpec((1, LANE), const),                       # fused head bias
    ]
    out_spec = pl.BlockSpec((tb, LANE), lambda i: (i, 0))

    out = pl.pallas_call(
        functools.partial(_encoder_kernel, latent_dim=latent_dim),
        out_shape=jax.ShapeDtypeStruct((Bp, LANE), jnp.float32),
        grid=grid,
        in_specs=in_specs,
        out_specs=out_spec,
        compiler_params=pltpu.CompilerParams(
            dimension_semantics=("parallel",),
            vmem_limit_bytes=32 * 1024 * 1024,
        ),
    )(x, w1_bf, b1, w2_bf, b2, w_head_bf, b_head)

    mu = out[:B, :latent_dim]
    sigma = out[:B, latent_dim:2 * latent_dim]
    return mu, sigma


@functools.partial(jax.jit, static_argnums=(2, 4, 5))
def vae_nmf_forward(x, packed, num_samples, key, N, W):
    """Mirrors VAE_NMF.forward: returns (mu, sigma, z). Jitted end-to-end so the
    slice + exp epilogue fuses with the kernel output readback."""
    x_flat = x.reshape(-1, N * W)
    latent_dim = N + W + 1
    mu, sigma = encoder_pallas(x_flat, packed, latent_dim)
    # LogNormal(mu, sigma).rsample((num_samples,)) == exp(mu + sigma * eps)
    eps = jax.random.normal(key, (num_samples,) + mu.shape, dtype=jnp.float32)
    z = jnp.exp(mu[None, :, :] + sigma[None, :, :] * eps)
    # torch's .squeeze(1) removes dim 1 only if it has size 1
    if z.shape[1] == 1:
        z = jnp.squeeze(z, axis=1)
    return mu, sigma, z


def init_params(key, input_dim, latent_dim):
    """Deterministic parameter init (matches nn.Linear shapes, stored transposed)."""
    keys = jax.random.split(key, 8)

    def linear(kw, kb, fan_in, fan_out):
        bound = 1.0 / jnp.sqrt(jnp.float32(fan_in))
        w = jax.random.uniform(kw, (fan_in, fan_out), jnp.float32, -bound, bound)
        b = jax.random.uniform(kb, (1, fan_out), jnp.float32, -bound, bound)
        return w, b

    w1, b1 = linear(keys[0], keys[1], input_dim, 1024)
    w2, b2 = linear(keys[2], keys[3], 1024, 512)
    w31, b31 = linear(keys[4], keys[5], 512, latent_dim)
    w32, b32 = linear(keys[6], keys[7], 512, latent_dim)
    return (w1, b1, w2, b2, w31, b31, w32, b32)


if __name__ == "__main__":
    # Small shapes consistent with the module: N x W NMF matrix, batch of
    # flattened N*W inputs.
    N, W = 4, 8
    input_dim = N * W          # 32
    latent_dim = N + W + 1     # 13
    batch = 2
    num_samples = 3

    root = jax.random.PRNGKey(0)
    k_params, k_x, k_eps = jax.random.split(root, 3)

    params = init_params(k_params, input_dim, latent_dim)
    packed = pack_params(params)   # one-time, outside the hot path
    # non-negative data, like an NMF target matrix
    x = jax.random.uniform(k_x, (batch, N, W), dtype=jnp.float32)

    mu, sigma, z = vae_nmf_forward(x, packed, num_samples, k_eps, N, W)
    jax.block_until_ready((mu, sigma, z))

    assert mu.shape == (batch, latent_dim)
    assert sigma.shape == (batch, latent_dim)
    assert z.shape == (num_samples, batch, latent_dim)
    # inclusive bounds: the sigmoid can saturate for extreme logits
    assert bool(jnp.all(sigma >= LOWER)) and bool(jnp.all(sigma <= UPPER))
    assert bool(jnp.all(z > 0.0))

    # Pure-JAX reference with the same mixed precision (bf16 operands,
    # f32 accumulation) to sanity-check the kernel.
    w1, b1, w2, b2, w31, b31, w32, b32 = params
    xf = x.reshape(-1, input_dim).astype(jnp.bfloat16)
    h = jnp.dot(xf, w1.astype(jnp.bfloat16),
                preferred_element_type=jnp.float32) + b1
    h = jnp.maximum(h, 0.0)
    h = jnp.dot(h.astype(jnp.bfloat16), w2.astype(jnp.bfloat16),
                preferred_element_type=jnp.float32) + b2
    h = jnp.maximum(h, 0.0)
    mu_ref = jnp.dot(h.astype(jnp.bfloat16), w31.astype(jnp.bfloat16),
                     preferred_element_type=jnp.float32) + b31
    logit_ref = jnp.dot(h.astype(jnp.bfloat16), w32.astype(jnp.bfloat16),
                        preferred_element_type=jnp.float32) + b32
    sig_ref = LOWER + (UPPER - LOWER) / (1.0 + jnp.exp(-SCALE_FACTOR * logit_ref))
    assert bool(jnp.allclose(mu, mu_ref, atol=2e-2, rtol=2e-2))
    assert bool(jnp.allclose(sigma, sig_ref, atol=2e-2, rtol=2e-2))

    print("KERNEL_OK")
</pallas_src>

<mosaic_0001>
module attributes {stable_mosaic.version = 11 : i64} {
  func.func @_encoder_kernel(%arg0: i32, %arg1: memref<16x32xbf16, #tpu.memory_space<vmem>>, %arg2: memref<32x1024xbf16, #tpu.memory_space<vmem>>, %arg3: memref<1x1024xf32, #tpu.memory_space<vmem>>, %arg4: memref<1024x512xbf16, #tpu.memory_space<vmem>>, %arg5: memref<1x512xf32, #tpu.memory_space<vmem>>, %arg6: memref<512x128xbf16, #tpu.memory_space<vmem>>, %arg7: memref<1x128xf32, #tpu.memory_space<vmem>>, %arg8: memref<16x128xf32, #tpu.memory_space<vmem>>) attributes {dimension_semantics = [#tpu.dimension_semantics<parallel>], iteration_bounds = array<i64: 1>, scalar_prefetch = 0 : i64, scratch_operands = 0 : i64, tpu.core_type = #tpu.core_type<tc>, window_params = [{transform_indices = @transform_0, window_bounds = array<i64: 16, 32>}, {pipeline_mode = #tpu.pipeline_mode<synchronous>, transform_indices = @transform_1, window_bounds = array<i64: 32, 1024>}, {pipeline_mode = #tpu.pipeline_mode<synchronous>, transform_indices = @transform_2, window_bounds = array<i64: 1, 1024>}, {pipeline_mode = #tpu.pipeline_mode<synchronous>, transform_indices = @transform_3, window_bounds = array<i64: 1024, 512>}, {pipeline_mode = #tpu.pipeline_mode<synchronous>, transform_indices = @transform_4, window_bounds = array<i64: 1, 512>}, {pipeline_mode = #tpu.pipeline_mode<synchronous>, transform_indices = @transform_5, window_bounds = array<i64: 512, 128>}, {pipeline_mode = #tpu.pipeline_mode<synchronous>, transform_indices = @transform_6, window_bounds = array<i64: 1, 128>}, {transform_indices = @transform_7, window_bounds = array<i64: 16, 128>}]} {
    %c0 = arith.constant 0 : index
    %c0_0 = arith.constant 0 : index
    %0 = vector.load %arg1[%c0, %c0_0] : memref<16x32xbf16, #tpu.memory_space<vmem>>, vector<16x32xbf16>
    %c0_1 = arith.constant 0 : index
    %c0_2 = arith.constant 0 : index
    %1 = vector.load %arg2[%c0_1, %c0_2] : memref<32x1024xbf16, #tpu.memory_space<vmem>>, vector<32x1024xbf16>
    %cst = arith.constant dense<0.000000e+00> : vector<16x1024xf32>
    %2 = tpu.matmul %0, %1, %cst {dimension_numbers = #tpu.dot_dimension_numbers<[1], [0], [0], [1], [0, 0, 1, 1], [], []>} : vector<16x32xbf16>, vector<32x1024xbf16>, vector<16x1024xf32> -> vector<16x1024xf32>
    %c0_3 = arith.constant 0 : index
    %c0_4 = arith.constant 0 : index
    %3 = vector.load %arg3[%c0_3, %c0_4] : memref<1x1024xf32, #tpu.memory_space<vmem>>, vector<1x1024xf32>
    %4 = vector.broadcast %3 : vector<1x1024xf32> to vector<16x1024xf32>
    %5 = arith.addf %2, %4 : vector<16x1024xf32>
    %cst_5 = arith.constant 0.000000e+00 : f32
    %6 = vector.broadcast %cst_5 : f32 to vector<16x1024xf32>
    %7 = arith.maximumf %5, %6 : vector<16x1024xf32>
    %8 = arith.truncf %7 : vector<16x1024xf32> to vector<16x1024xbf16>
    %c0_6 = arith.constant 0 : index
    %c0_7 = arith.constant 0 : index
    %9 = vector.load %arg4[%c0_6, %c0_7] : memref<1024x512xbf16, #tpu.memory_space<vmem>>, vector<1024x512xbf16>
    %cst_8 = arith.constant dense<0.000000e+00> : vector<16x512xf32>
    %10 = tpu.matmul %8, %9, %cst_8 {dimension_numbers = #tpu.dot_dimension_numbers<[1], [0], [0], [1], [0, 0, 1, 1], [], []>} : vector<16x1024xbf16>, vector<1024x512xbf16>, vector<16x512xf32> -> vector<16x512xf32>
    %c0_9 = arith.constant 0 : index
    %c0_10 = arith.constant 0 : index
    %11 = vector.load %arg5[%c0_9, %c0_10] : memref<1x512xf32, #tpu.memory_space<vmem>>, vector<1x512xf32>
    %12 = vector.broadcast %11 : vector<1x512xf32> to vector<16x512xf32>
    %13 = arith.addf %10, %12 : vector<16x512xf32>
    %cst_11 = arith.constant 0.000000e+00 : f32
    %14 = vector.broadcast %cst_11 : f32 to vector<16x512xf32>
    %15 = arith.maximumf %13, %14 : vector<16x512xf32>
    %16 = arith.truncf %15 : vector<16x512xf32> to vector<16x512xbf16>
    %c0_12 = arith.constant 0 : index
    %c0_13 = arith.constant 0 : index
    %17 = vector.load %arg6[%c0_12, %c0_13] : memref<512x128xbf16, #tpu.memory_space<vmem>>, vector<512x128xbf16>
    %cst_14 = arith.constant dense<0.000000e+00> : vector<16x128xf32>
    %18 = tpu.matmul %16, %17, %cst_14 {dimension_numbers = #tpu.dot_dimension_numbers<[1], [0], [0], [1], [0, 0, 1, 1], [], []>} : vector<16x512xbf16>, vector<512x128xbf16>, vector<16x128xf32> -> vector<16x128xf32>
    %c0_15 = arith.constant 0 : index
    %c0_16 = arith.constant 0 : index
    %19 = vector.load %arg7[%c0_15, %c0_16] : memref<1x128xf32, #tpu.memory_space<vmem>>, vector<1x128xf32>
    %20 = vector.broadcast %19 : vector<1x128xf32> to vector<16x128xf32>
    %21 = arith.addf %18, %20 : vector<16x128xf32>
    %cst_17 = arith.constant -5.000000e-01 : f32
    %22 = vector.broadcast %cst_17 : f32 to vector<16x128xf32>
    %23 = arith.mulf %22, %21 : vector<16x128xf32>
    %24 = math.exp %23 : vector<16x128xf32>
    %cst_18 = arith.constant 1.000000e+00 : f32
    %25 = vector.broadcast %cst_18 : f32 to vector<16x128xf32>
    %26 = arith.addf %25, %24 : vector<16x128xf32>
    %27 = tpu.reciprocal %26 {approx = true} : vector<16x128xf32> -> vector<16x128xf32>
    %cst_19 = arith.constant 1.499900e+00 : f32
    %28 = vector.broadcast %cst_19 : f32 to vector<16x128xf32>
    %29 = arith.mulf %28, %27 : vector<16x128xf32>
    %cst_20 = arith.constant 9.99999974E-5 : f32
    %30 = vector.broadcast %cst_20 : f32 to vector<16x128xf32>
    %31 = arith.addf %30, %29 : vector<16x128xf32>
    %32 = tpu.iota {dimensions = array<i32: 1>} : vector<16x128xi32>
    %c13_i32 = arith.constant 13 : i32
    %33 = vector.broadcast %c13_i32 : i32 to vector<16x128xi32>
    %34 = arith.cmpi slt, %32, %33 : vector<16x128xi32>
    %35 = arith.select %34, %21, %31 : vector<16x128xi1>, vector<16x128xf32>
    %c0_21 = arith.constant 0 : index
    %c0_22 = arith.constant 0 : index
    %36 = vector.load %arg8[%c0_21, %c0_22] : memref<16x128xf32, #tpu.memory_space<vmem>>, vector<16x128xf32>
    tpu.vector_store %arg8[%c0_21, %c0_22], %35 {strides = array<i32>} : memref<16x128xf32, #tpu.memory_space<vmem>>, vector<16x128xf32>,
    return
  }
  func.func @transform_0(%arg0: i32) -> (i32, i32) {
    %c0_i32 = arith.constant 0 : i32
    %c0_i32_0 = arith.constant 0 : i32
    return %arg0, %c0_i32 : i32, i32
  }
  func.func @transform_1(%arg0: i32) -> (i32, i32) {
    %c0_i32 = arith.constant 0 : i32
    %c0_i32_0 = arith.constant 0 : i32
    %c0_i32_1 = arith.constant 0 : i32
    return %c0_i32, %c0_i32_0 : i32, i32
  }
  func.func @transform_2(%arg0: i32) -> (i32, i32) {
    %c0_i32 = arith.constant 0 : i32
    %c0_i32_0 = arith.constant 0 : i32
    %c0_i32_1 = arith.constant 0 : i32
    return %c0_i32, %c0_i32_0 : i32, i32
  }
  func.func @transform_3(%arg0: i32) -> (i32, i32) {
    %c0_i32 = arith.constant 0 : i32
    %c0_i32_0 = arith.constant 0 : i32
    %c0_i32_1 = arith.constant 0 : i32
    return %c0_i32, %c0_i32_0 : i32, i32
  }
  func.func @transform_4(%arg0: i32) -> (i32, i32) {
    %c0_i32 = arith.constant 0 : i32
    %c0_i32_0 = arith.constant 0 : i32
    %c0_i32_1 = arith.constant 0 : i32
    return %c0_i32, %c0_i32_0 : i32, i32
  }
  func.func @transform_5(%arg0: i32) -> (i32, i32) {
    %c0_i32 = arith.constant 0 : i32
    %c0_i32_0 = arith.constant 0 : i32
    %c0_i32_1 = arith.constant 0 : i32
    return %c0_i32, %c0_i32_0 : i32, i32
  }
  func.func @transform_6(%arg0: i32) -> (i32, i32) {
    %c0_i32 = arith.constant 0 : i32
    %c0_i32_0 = arith.constant 0 : i32
    %c0_i32_1 = arith.constant 0 : i32
    return %c0_i32, %c0_i32_0 : i32, i32
  }
  func.func @transform_7(%arg0: i32) -> (i32, i32) {
    %c0_i32 = arith.constant 0 : i32
    %c0_i32_0 = arith.constant 0 : i32
    return %arg0, %c0_i32 : i32, i32
  }
}

</mosaic_0001>

<bundles_post_ra>
// kernel: vae_nmf_forward.1
= control target key start
LH: loop header
LB: loop body
LE: loop exit
PB: predicated region body
PF: predicated region fallthrough
CT: control target
= control target key end

     0   :  { %12 = vsyncpa [#allocation3], 0  ;;  %s3715_s0 = inlined_call_operand.vmem [shape: bf16[16,32], index: 0, kind: input, shape index: {}]   ;;  %s3716_s1 = inlined_call_operand.hbm [shape: bf16[32,1024], index: 1, kind: input, shape index: {}]   ;;  %s3717_s2 = inlined_call_operand.vmem [shape: f32[1,1024], index: 2, kind: input, shape index: {}]   ;;  %s3718_s3 = inlined_call_operand.hbm [shape: bf16[1024,512], index: 3, kind: input, shape index: {}]   ;;  %s3719_s4 = inlined_call_operand.vmem [shape: f32[1,512], index: 4, kind: input, shape index: {}]   ;;  %s3720_s5 = inlined_call_operand.hbm [shape: bf16[512,128], index: 5, kind: input, shape index: {}]   ;;  %s3721_s6 = inlined_call_operand.vmem [shape: f32[1,128], index: 6, kind: input, shape index: {}]   ;;  %s3722_s7 = inlined_call_operand.vmem [shape: f32[16,128], index: 7, kind: output, shape index: {}]  }
   0x1   :  { %13 = vsyncpa [#allocation5], 0  ;;  %s3552_s24 = smov [#allocation4]  }
   0x2   :  { %s35_s25 = sshll.u32 %s3552_s24, 4  ;;  %s36_s25 = int_to_ptr.vmem [resolvable:$true] %s35_s25 }
   0x3   :  { %s3496_s26 = scalar_lea.vmem %s36_s25, 32768  ;;  %p3501_p1 = scmp.lt.s32.totalorder %s36_s25, %s36_s25 }
   0x4   :  { %p3497_p0 = scmp.ne.s32.totalorder %s36_s25, %s3496_s26  ;;  %p3502_p2 = scmp.lt.s32.totalorder %s3496_s26, %s3496_s26 }
   0x6   :  { %p3503_p3 = por %p3502_p2, %p3501_p1 }
   0x8   :  { %p3504_p4 = pnand %p3503_p3, %p3497_p0 }
   0xa   :  { %3507 = shalt.err (!%p3504_p4)
}
   0xb   :  { %s3553_s27 = smov 256   ;;  %s3554_s28 = smov 16  }
   0xc   :  { %41 = dma.hbm_to_vmem [thread:$0]  %s3718_s3, 32768, %s36_s25, [#allocation5], %s3553_s27, %s3553_s27, %s3554_s28  }
   0xd   :  { %s3555_s8 = smov [#allocation2]  }
   0xe   :  { %s21_s9 = sshll.u32 %s3555_s8, 4  ;;  %s22_s9 = int_to_ptr.vmem [resolvable:$true] %s21_s9 }
   0xf   :  { %s3516_s10 = scalar_lea.vmem %s22_s9, 2048  ;;  %p3521_p6 = scmp.lt.s32.totalorder %s22_s9, %s22_s9 }
  0x10   :  { %p3517_p5 = scmp.ne.s32.totalorder %s22_s9, %s3516_s10  ;;  %p3522_p7 = scmp.lt.s32.totalorder %s3516_s10, %s3516_s10 }
  0x12   :  { %p3523_p8 = por %p3522_p7, %p3521_p6 }
  0x14   :  { %p3524_p9 = pnand %p3523_p8, %p3517_p5 }
  0x16   :  { %3527 = shalt.err (!%p3524_p9)
}
  0x17   :  { %s3556_s11 = smov 512   ;;  %s3557_s12 = smov 32  }
  0x18   :  { %27 = dma.hbm_to_vmem [thread:$0]  %s3716_s1, 2048, %s22_s9, [#allocation3], %s3556_s11, %s3556_s11, %s3557_s12  }
  0x19   :  { %s3558_s15 = smov [#allocation6]  }
  0x1a   :  { %s49_s16 = sshll.u32 %s3558_s15, 4  ;;  %s50_s16 = int_to_ptr.vmem [resolvable:$true] %s49_s16 }
  0x1b   :  { %s3536_s3 = scalar_lea.vmem %s50_s16, 4096  ;;  %p3541_p11 = scmp.lt.s32.totalorder %s50_s16, %s50_s16 }
  0x1c   :  { %p3537_p10 = scmp.ne.s32.totalorder %s50_s16, %s3536_s3  ;;  %p3542_p12 = scmp.lt.s32.totalorder %s3536_s3, %s3536_s3 }
  0x1e   :  { %p3543_p13 = por %p3542_p12, %p3541_p11 }
  0x20   :  { %p3544_p0 = pnand %p3543_p13, %p3537_p10 }
  0x22   :  { %3547 = shalt.err (!%p3544_p0)
}
  0x23   :  { %s3559_s17 = smov 64   ;;  %s3560_s18 = smov 4  }
  0x24   :  { %55 = dma.hbm_to_vmem [thread:$0]  %s3720_s5, 4096, %s50_s16, [#allocation5], %s3559_s17, %s3559_s17, %s3560_s18  }
  0x25   :  { %3548 = dma.done.wait [#allocation3], 2048  }
  0x26   :  { %3549 = vsyncadd [#allocation3], 4294965248 }
  0x27   :  { %3550 = dma.done.wait [#allocation5], 36864  }
  0x28   :  { %3551 = vsyncadd [#allocation5], 4294930432  ;;  %v3561_v0 = vmov 0   ;;  %v78_v1 = vld [vmem:[#allocation2 + $0x40] sm:$0xff]  ;;  %v79_v3 = vld [vmem:[#allocation2 + $0x48] sm:$0xff]  ;;  %vm213_vm0 = vcmask 261120  }
  0x29   :  { %249 = vmatprep.mubr.bf16.mxu0 %v3561_v0  ;;  %292 = vmatprep.mubr.bf16.mxu1 %v3561_v0  ;;  %v82_v2 = vld [vmem:[#allocation2 + $0x60] sm:$0xff]  ;;  %v83_v5 = vld [vmem:[#allocation2 + $0x68] sm:$0xff]  ;;  %v80_v15 = vld [vmem:[#allocation2 + $0x50] sm:$0xff] }
  0x2a   :  { %v2709_v4 = vcombine.high %v78_v1, %v82_v2  ;;  %v2708_v6 = vcombine.low %v78_v1, %v82_v2  ;;  %v70_v7 = vld [vmem:[#allocation2] sm:$0xff]  ;;  %v2711_v9 = vcombine.high %v79_v3, %v83_v5  ;;  %v2710_v10 = vcombine.low %v79_v3, %v83_v5  ;;  %v71_v12 = vld [vmem:[#allocation2 + $0x8] sm:$0xff]  ;;  %v84_v17 = vld [vmem:[#allocation2 + $0x70] sm:$0xff] }
  0x2b   :  { %v74_v8 = vld [vmem:[#allocation2 + $0x20] sm:$0xff]  ;;  %v75_v13 = vld [vmem:[#allocation2 + $0x28] sm:$0xff]  ;;  %v81_v18 = vld [vmem:[#allocation2 + $0x58] sm:$0xff]  ;;  %v2713_v22 = vcombine.high %v80_v15, %v84_v17  ;;  %v2712_v28 = vcombine.low %v80_v15, %v84_v17 }
  0x2c   :  { %v2701_v11 = vcombine.high %v70_v7, %v74_v8  ;;  %229 = vmatprep.subr.bf16.mxu0 %v2709_v4  ;;  %v2703_v14 = vcombine.high %v71_v12, %v75_v13  ;;  %272 = vmatprep.subr.bf16.mxu1 %v2711_v9  ;;  %v2700_v16 = vcombine.low %v70_v7, %v74_v8  ;;  %v85_v19 = vld [vmem:[#allocation2 + $0x78] sm:$0xff]  ;;  %v3063_v21 = vld [vmem:[%s3715_s0] sm:$0xff]   ;;  %v72_v23 = vld [vmem:[#allocation2 + $0x10] sm:$0xff] }
  0x2d   :  { %230 = vmatpush1.bf16.msra.mxu0 %v2708_v6  ;;  %273 = vmatpush1.bf16.msra.mxu1 %v2710_v10  ;;  %v2702_v20 = vcombine.low %v71_v12, %v75_v13  ;;  %v2715_v24 = vcombine.high %v81_v18, %v85_v19  ;;  %v76_v25 = vld [vmem:[#allocation2 + $0x30] sm:$0xff]  ;;  %v73_v26 = vld [vmem:[#allocation2 + $0x18] sm:$0xff]  ;;  %v2714_v29 = vcombine.low %v81_v18, %v85_v19 }
  0x2e   :  { %231 = vmatprep.subr.bf16.mxu0 %v2701_v11  ;;  %274 = vmatprep.subr.bf16.mxu1 %v2703_v14  ;;  %v77_v27 = vld [vmem:[#allocation2 + $0x38] sm:$0xff]  ;;  %v2705_v30 = vcombine.high %v72_v23, %v76_v25  ;;  %v2704_v32 = vcombine.low %v72_v23, %v76_v25  ;;  %v3066_v34 = vld [vmem:[#allocation4 + $0xe4] ss:$16 sps:$4 sm:$0xff]   ;;  %v3064_v36 = vld [vmem:[#allocation4 + $0xe0] ss:$16 sps:$4 sm:$0xff]  }
  0x2f   :  { %v2707_v31 = vcombine.high %v73_v26, %v77_v27  ;;  %v2706_v33 = vcombine.low %v73_v26, %v77_v27  ;;  %v3069_v35 = vld [vmem:[#allocation4 + $0x2e4] ss:$16 sps:$4 sm:$0xff]   ;;  %v3067_v37 = vld [vmem:[#allocation4 + $0x2e0] ss:$16 sps:$4 sm:$0xff]  }
  0x30   :  { %v3072_v38 = vld [vmem:[#allocation4 + $0xc4] ss:$16 sps:$4 sm:$0xff]   ;;  %v3070_v40 = vld [vmem:[#allocation4 + $0xc0] ss:$16 sps:$4 sm:$0xff]  }
  0x31   :  { %232 = vmatpush1.bf16.msra.mxu0 %v2700_v16  ;;  %275 = vmatpush1.bf16.msra.mxu1 %v2702_v20  ;;  %v3075_v39 = vld [vmem:[#allocation4 + $0x2c4] ss:$16 sps:$4 sm:$0xff]   ;;  %v3073_v41 = vld [vmem:[#allocation4 + $0x2c0] ss:$16 sps:$4 sm:$0xff]  }
  0x32   :  { %315 = vmatprep.subr.bf16.mxu0 %v2713_v22  ;;  %358 = vmatprep.subr.bf16.mxu1 %v2715_v24  ;;  %v3078_v42 = vld [vmem:[#allocation4 + $0xa4] ss:$16 sps:$4 sm:$0xff]   ;;  %v3076_v44 = vld [vmem:[#allocation4 + $0xa0] ss:$16 sps:$4 sm:$0xff]  }
  0x33   :  { %v3081_v43 = vld [vmem:[#allocation4 + $0x2a4] ss:$16 sps:$4 sm:$0xff]   ;;  %v3079_v45 = vld [vmem:[#allocation4 + $0x2a0] ss:$16 sps:$4 sm:$0xff]  }
  0x34   :  { %2716 = vmatmul.mubr.msk.bf16.vlgmr.msra.gmra.mxu0 %vm213_vm0, %v3063_v21  ;;  %2717 = vmatmul.mubr.msk.bf16.vlgmr.msra.gmra.mxu1 %vm213_vm0, %v3063_v21  ;;  %v3084_v46 = vld [vmem:[#allocation4 + $0x84] ss:$16 sps:$4 sm:$0xff]   ;;  %v3082_v48 = vld [vmem:[#allocation4 + $0x80] ss:$16 sps:$4 sm:$0xff]  }
  0x35   :  { %316 = vmatpush1.bf16.msra.mxu0 %v2712_v28  ;;  %359 = vmatpush1.bf16.msra.mxu1 %v2714_v29  ;;  %v3087_v47 = vld [vmem:[#allocation4 + $0x284] ss:$16 sps:$4 sm:$0xff]   ;;  %v3085_v49 = vld [vmem:[#allocation4 + $0x280] ss:$16 sps:$4 sm:$0xff]  }
  0x36   :  { %317 = vmatprep.subr.bf16.mxu0 %v2705_v30  ;;  %360 = vmatprep.subr.bf16.mxu1 %v2707_v31  ;;  %v3090_v50 = vld [vmem:[#allocation4 + $0x64] ss:$16 sps:$4 sm:$0xff]   ;;  %v3088_v52 = vld [vmem:[#allocation4 + $0x60] ss:$16 sps:$4 sm:$0xff]  }
  0x37   :  { %335 = vmatprep.mubr.bf16.mxu0 %v3561_v0  ;;  %378 = vmatprep.mubr.bf16.mxu1 %v3561_v0  ;;  %v3093_v51 = vld [vmem:[#allocation4 + $0x264] ss:$16 sps:$4 sm:$0xff]   ;;  %v3091_v53 = vld [vmem:[#allocation4 + $0x260] ss:$16 sps:$4 sm:$0xff]  }
  0x38   :  { %v3096_v54 = vld [vmem:[#allocation4 + $0x44] ss:$16 sps:$4 sm:$0xff]   ;;  %v3094_v56 = vld [vmem:[#allocation4 + $0x40] ss:$16 sps:$4 sm:$0xff]  }
  0x39   :  { %318 = vmatpush1.bf16.msra.mxu0 %v2704_v32  ;;  %361 = vmatpush1.bf16.msra.mxu1 %v2706_v33  ;;  %v3099_v55 = vld [vmem:[#allocation4 + $0x244] ss:$16 sps:$4 sm:$0xff]   ;;  %v3097_v57 = vld [vmem:[#allocation4 + $0x240] ss:$16 sps:$4 sm:$0xff]  }
  0x3a   :  { %1971 = vmatprep.subr.bf16.mxu0 %v3066_v34  ;;  %2014 = vmatprep.subr.bf16.mxu1 %v3069_v35  ;;  %v3102_v58 = vld [vmem:[#allocation4 + $0x24] ss:$16 sps:$4 sm:$0xff]   ;;  %v3100_v60 = vld [vmem:[#allocation4 + $0x20] ss:$16 sps:$4 sm:$0xff]  }
  0x3b   :  { %v3105_v59 = vld [vmem:[#allocation4 + $0x224] ss:$16 sps:$4 sm:$0xff]   ;;  %v3103_v61 = vld [vmem:[#allocation4 + $0x220] ss:$16 sps:$4 sm:$0xff]  }
  0x3c   :  { %2718 = vmatmul.mubr.msk.bf16.vlgmr.msra.gmra.mxu0 %vm213_vm0, %v3063_v21  ;;  %2719 = vmatmul.mubr.msk.bf16.vlgmr.msra.gmra.mxu1 %vm213_vm0, %v3063_v21  ;;  %v3108_v62 = vld [vmem:[#allocation4 + $0x4] ss:$16 sps:$4 sm:$0xff]   ;;  %v3106_v0 = vld [vmem:[#allocation4] ss:$16 sps:$4 sm:$0xff]  }
  0x3d   :  { %1972 = vmatpush1.bf16.msra.mxu0 %v3064_v36  ;;  %2015 = vmatpush1.bf16.msra.mxu1 %v3067_v37  ;;  %v3111_v63 = vld [vmem:[#allocation4 + $0x204] ss:$16 sps:$4 sm:$0xff]   ;;  %v3109_v1 = vld [vmem:[#allocation4 + $0x200] ss:$16 sps:$4 sm:$0xff]   ;;  %v88_v36 = vlaneseq }
  0x3e   :  { %1973 = vmatprep.subr.bf16.mxu0 %v3072_v38  ;;  %2016 = vmatprep.subr.bf16.mxu1 %v3075_v39  ;;  %v3114_v2 = vld [vmem:[#allocation4 + $0x1e4] ss:$16 sps:$4 sm:$0xff]   ;;  %v3112_v4 = vld [vmem:[#allocation4 + $0x1e0] ss:$16 sps:$4 sm:$0xff]  }
  0x3f   :  { %v3117_v3 = vld [vmem:[#allocation4 + $0x3e4] ss:$16 sps:$4 sm:$0xff]   ;;  %v3115_v5 = vld [vmem:[#allocation4 + $0x3e0] ss:$16 sps:$4 sm:$0xff]   ;;  %v3619_v37 = vshrl.u32 %v88_v36, 7 }
  0x40   :  { %v3120_v6 = vld [vmem:[#allocation4 + $0x1c4] ss:$16 sps:$4 sm:$0xff]   ;;  %v3118_v8 = vld [vmem:[#allocation4 + $0x1c0] ss:$16 sps:$4 sm:$0xff]  }
  0x41   :  { %1974 = vmatpush1.bf16.msra.mxu0 %v3070_v40  ;;  %2017 = vmatpush1.bf16.msra.mxu1 %v3073_v41  ;;  %v3123_v7 = vld [vmem:[#allocation4 + $0x3c4] ss:$16 sps:$4 sm:$0xff]   ;;  %v3121_v9 = vld [vmem:[#allocation4 + $0x3c0] ss:$16 sps:$4 sm:$0xff]   ;;  %v94_v38 = vsub.s32 1, %v3619_v37  ;;  %v90_v39 = vsub.s32 0, %v3619_v37 }
  0x42   :  { %1975 = vmatprep.subr.bf16.mxu0 %v3078_v42  ;;  %2018 = vmatprep.subr.bf16.mxu1 %v3081_v43  ;;  %v3126_v10 = vld [vmem:[#allocation4 + $0x1a4] ss:$16 sps:$4 sm:$0xff]   ;;  %v3124_v12 = vld [vmem:[#allocation4 + $0x1a0] ss:$16 sps:$4 sm:$0xff]   ;;  %v102_v40 = vsub.s32 3, %v3619_v37  ;;  %v98_v42 = vsub.s32 2, %v3619_v37 }
  0x43   :  { %v3129_v11 = vld [vmem:[#allocation4 + $0x3a4] ss:$16 sps:$4 sm:$0xff]   ;;  %v3127_v13 = vld [vmem:[#allocation4 + $0x3a0] ss:$16 sps:$4 sm:$0xff]  }
  0x44   :  { %v3132_v14 = vld [vmem:[#allocation4 + $0x184] ss:$16 sps:$4 sm:$0xff]   ;;  %v3130_v16 = vld [vmem:[#allocation4 + $0x180] ss:$16 sps:$4 sm:$0xff]  }
  0x45   :  { %1976 = vmatpush1.bf16.msra.mxu0 %v3076_v44  ;;  %2019 = vmatpush1.bf16.msra.mxu1 %v3079_v45  ;;  %v3135_v15 = vld [vmem:[#allocation4 + $0x384] ss:$16 sps:$4 sm:$0xff]   ;;  %v3133_v17 = vld [vmem:[#allocation4 + $0x380] ss:$16 sps:$4 sm:$0xff]  }
  0x46   :  { %1977 = vmatprep.subr.bf16.mxu0 %v3084_v46  ;;  %2020 = vmatprep.subr.bf16.mxu1 %v3087_v47  ;;  %v3138_v18 = vld [vmem:[#allocation4 + $0x164] ss:$16 sps:$4 sm:$0xff]   ;;  %v3136_v20 = vld [vmem:[#allocation4 + $0x160] ss:$16 sps:$4 sm:$0xff]  }
  0x47   :  { %v3141_v19 = vld [vmem:[#allocation4 + $0x364] ss:$16 sps:$4 sm:$0xff]   ;;  %v3139_v21 = vld [vmem:[#allocation4 + $0x360] ss:$16 sps:$4 sm:$0xff]  }
  0x48   :  { %v3144_v22 = vld [vmem:[#allocation4 + $0x144] ss:$16 sps:$4 sm:$0xff]   ;;  %v3142_v24 = vld [vmem:[#allocation4 + $0x140] ss:$16 sps:$4 sm:$0xff]  }
  0x49   :  { %1978 = vmatpush1.bf16.msra.mxu0 %v3082_v48  ;;  %2021 = vmatpush1.bf16.msra.mxu1 %v3085_v49  ;;  %v3147_v23 = vld [vmem:[#allocation4 + $0x344] ss:$16 sps:$4 sm:$0xff]   ;;  %v3145_v25 = vld [vmem:[#allocation4 + $0x340] ss:$16 sps:$4 sm:$0xff]  }
  0x4a   :  { %1979 = vmatprep.subr.bf16.mxu0 %v3090_v50  ;;  %2022 = vmatprep.subr.bf16.mxu1 %v3093_v51  ;;  %v3150_v26 = vld [vmem:[#allocation4 + $0x124] ss:$16 sps:$4 sm:$0xff]   ;;  %v3148_v28 = vld [vmem:[#allocation4 + $0x120] ss:$16 sps:$4 sm:$0xff]   ;;  %v110_v51 = vsub.s32 5, %v3619_v37 }
  0x4b   :  { %v3153_v27 = vld [vmem:[#allocation4 + $0x324] ss:$16 sps:$4 sm:$0xff]   ;;  %v3151_v29 = vld [vmem:[#allocation4 + $0x320] ss:$16 sps:$4 sm:$0xff]  }
  0x4c   :  { %v3156_v30 = vld [vmem:[#allocation4 + $0x104] ss:$16 sps:$4 sm:$0xff]   ;;  %v3154_v32 = vld [vmem:[#allocation4 + $0x100] ss:$16 sps:$4 sm:$0xff]  }
  0x4d   :  { %1980 = vmatpush1.bf16.msra.mxu0 %v3088_v52  ;;  %2023 = vmatpush1.bf16.msra.mxu1 %v3091_v53  ;;  %v3159_v31 = vld [vmem:[#allocation4 + $0x304] ss:$16 sps:$4 sm:$0xff]   ;;  %v3157_v33 = vld [vmem:[#allocation4 + $0x300] ss:$16 sps:$4 sm:$0xff]   ;;  %v118_v53 = vsub.s32 7, %v3619_v37 }
  0x4e   :  { %1981 = vmatprep.subr.bf16.mxu0 %v3096_v54  ;;  %2024 = vmatprep.subr.bf16.mxu1 %v3099_v55  ;;  %v3162_v34 = vld [vmem:[#allocation4 + $0x4e4] ss:$16 sps:$4 sm:$0xff]  }
  0x4f   :  { %v3165_v35 = vld [vmem:[#allocation4 + $0x6e4] ss:$16 sps:$4 sm:$0xff]  }
  0x50   :  { %v3627_v41 = vld [vmem:[%s3717_s2] sm:$0xff] }
  0x51   :  { %1982 = vmatpush1.bf16.msra.mxu0 %v3094_v56  ;;  %2025 = vmatpush1.bf16.msra.mxu1 %v3097_v57  ;;  %v95_v45 = vrot.slane %v3627_v41, %v94_v38  ;;  %v91_v46 = vrot.slane %v3627_v41, %v90_v39  ;;  %v103_v48 = vrot.slane %v3627_v41, %v102_v40 }
  0x52   :  { %1983 = vmatprep.subr.bf16.mxu0 %v3102_v58  ;;  %2026 = vmatprep.subr.bf16.mxu1 %v3105_v59  ;;  %v99_v49 = vrot.slane %v3627_v41, %v98_v42 }
  0x55   :  { %1984 = vmatpush1.bf16.msra.mxu0 %v3100_v60  ;;  %2027 = vmatpush1.bf16.msra.mxu1 %v3103_v61 }
  0x56   :  { %1985 = vmatprep.subr.bf16.mxu0 %v3108_v62  ;;  %2028 = vmatprep.subr.bf16.mxu1 %v3111_v63 }
  0x59   :  { %1986 = vmatpush1.bf16.msra.mxu0 %v3106_v0  ;;  %2029 = vmatpush1.bf16.msra.mxu1 %v3109_v1  ;;  %v111_v0 = vrot.slane %v3627_v41, %v110_v51  ;;  %v3183_v51 = vld [vmem:[#allocation4 + $0x684] ss:$16 sps:$4 sm:$0xff]  }
  0x5a   :  { %1987 = vmatprep.subr.bf16.mxu0 %v3114_v2  ;;  %2030 = vmatprep.subr.bf16.mxu1 %v3117_v3 }
  0x5d   :  { %1988 = vmatpush2.bf16.msra.mxu0 %v3112_v4  ;;  %2031 = vmatpush2.bf16.msra.mxu1 %v3115_v5  ;;  %v119_v4 = vrot.slane %v3627_v41, %v118_v53  ;;  %v3181_v53 = vld [vmem:[#allocation4 + $0x680] ss:$16 sps:$4 sm:$0xff]  }
  0x5e   :  { %1989 = vmatprep.subr.bf16.mxu0 %v3120_v6  ;;  %2032 = vmatprep.subr.bf16.mxu1 %v3123_v7 }
  0x61   :  { %1990 = vmatpush2.bf16.msra.mxu0 %v3118_v8  ;;  %2033 = vmatpush2.bf16.msra.mxu1 %v3121_v9 }
  0x62   :  { %1991 = vmatprep.subr.bf16.mxu0 %v3126_v10  ;;  %2034 = vmatprep.subr.bf16.mxu1 %v3129_v11 }
  0x65   :  { %1992 = vmatpush2.bf16.msra.mxu0 %v3124_v12  ;;  %2035 = vmatpush2.bf16.msra.mxu1 %v3127_v13 }
  0x66   :  { %1993 = vmatprep.subr.bf16.mxu0 %v3132_v14  ;;  %2036 = vmatprep.subr.bf16.mxu1 %v3135_v15  ;;  %v3160_v15 = vld [vmem:[#allocation4 + $0x4e0] ss:$16 sps:$4 sm:$0xff]  }
  0x69   :  { %1994 = vmatpush2.bf16.msra.mxu0 %v3130_v16  ;;  %2037 = vmatpush2.bf16.msra.mxu1 %v3133_v17 }
  0x6a   :  { %1995 = vmatprep.subr.bf16.mxu0 %v3138_v18  ;;  %2038 = vmatprep.subr.bf16.mxu1 %v3141_v19 }
  0x6d   :  { %1996 = vmatpush2.bf16.msra.mxu0 %v3136_v20  ;;  %2039 = vmatpush2.bf16.msra.mxu1 %v3139_v21  ;;  %v3163_v20 = vld [vmem:[#allocation4 + $0x6e0] ss:$16 sps:$4 sm:$0xff]   ;;  %v3168_v21 = vld [vmem:[#allocation4 + $0x4c4] ss:$16 sps:$4 sm:$0xff]  }
  0x6e   :  { %1997 = vmatprep.subr.bf16.mxu0 %v3144_v22  ;;  %2040 = vmatprep.subr.bf16.mxu1 %v3147_v23 }
  0x71   :  { %1998 = vmatpush2.bf16.msra.mxu0 %v3142_v24  ;;  %2041 = vmatpush2.bf16.msra.mxu1 %v3145_v25  ;;  %v3171_v25 = vld [vmem:[#allocation4 + $0x6c4] ss:$16 sps:$4 sm:$0xff]  }
  0x72   :  { %1999 = vmatprep.subr.bf16.mxu0 %v3150_v26  ;;  %2042 = vmatprep.subr.bf16.mxu1 %v3153_v27 }
  0x75   :  { %2000 = vmatpush2.bf16.msra.mxu0 %v3148_v28  ;;  %2043 = vmatpush2.bf16.msra.mxu1 %v3151_v29  ;;  %v3166_v28 = vld [vmem:[#allocation4 + $0x4c0] ss:$16 sps:$4 sm:$0xff]  }
  0x76   :  { %2001 = vmatprep.subr.bf16.mxu0 %v3156_v30  ;;  %2044 = vmatprep.subr.bf16.mxu1 %v3159_v31 }
  0x79   :  { %2002 = vmatpush2.bf16.msra.mxu0 %v3154_v32  ;;  %2045 = vmatpush2.bf16.msra.mxu1 %v3157_v33  ;;  %v3169_v32 = vld [vmem:[#allocation4 + $0x6c0] ss:$16 sps:$4 sm:$0xff]   ;;  %v3174_v33 = vld [vmem:[#allocation4 + $0x4a4] ss:$16 sps:$4 sm:$0xff]  }
  0x7a   :  { %2057 = vmatprep.subr.bf16.mxu0 %v3162_v34  ;;  %2100 = vmatprep.subr.bf16.mxu1 %v3165_v35 }
  0xf4   :  { %v251_v43 = vpop.f32.mrf.mxu0  ;;  %v294_v44 = vpop.f32.mrf.mxu1 }
  0xf5   :  { %v252_v57 = vadd.f32 %v251_v43, %v91_v46  ;;  %v295_v61 = vadd.f32 %v294_v44, %v99_v49  ;;  %v3177_v43 = vld [vmem:[#allocation4 + $0x6a4] ss:$16 sps:$4 sm:$0xff]  }
  0xf6   :  { %v253_v47 = vpop.f32.mrf.mxu0  ;;  %v296_v50 = vpop.f32.mrf.mxu1 }
  0xf7   :  { %v254_v54 = vadd.f32 %v253_v47, %v95_v45  ;;  %v297_v58 = vadd.f32 %v296_v50, %v103_v48  ;;  %v389_v9 = vmax.f32 %v252_v57, 0.0  ;;  %v391_v13 = vmax.f32 %v295_v61, 0.0  ;;  %v3187_v57 = vld [vmem:[#allocation4 + $0x660] ss:$16 sps:$4 sm:$0xff]  }
  0xf8   :  { %v255_v52 = vpop.f32.mrf.mxu0  ;;  %v298_v56 = vpop.f32.mrf.mxu1  ;;  %v3193_v61 = vld [vmem:[#allocation4 + $0x640] ss:$16 sps:$4 sm:$0xff]  }
  0xf9   :  { %v256_v55 = vadd.f32 %v255_v52, %v91_v46  ;;  %v299_v59 = vadd.f32 %v298_v56, %v99_v49  ;;  %v390_v5 = vmax.f32 %v254_v54, 0.0  ;;  %v392_v10 = vmax.f32 %v297_v58, 0.0  ;;  %v3172_v46 = vld [vmem:[#allocation4 + $0x4a0] ss:$16 sps:$4 sm:$0xff]   ;;  %v3180_v49 = vld [vmem:[#allocation4 + $0x484] ss:$16 sps:$4 sm:$0xff]  }
  0xfa   :  { %v257_v60 = vpop.f32.mrf.mxu0  ;;  %v300_v63 = vpop.f32.mrf.mxu1  ;;  %v3178_v52 = vld [vmem:[#allocation4 + $0x480] ss:$16 sps:$4 sm:$0xff]   ;;  %v3186_v54 = vld [vmem:[#allocation4 + $0x464] ss:$16 sps:$4 sm:$0xff]  }
  0xfb   :  { %v258_v62 = vadd.f32 %v257_v60, %v95_v45  ;;  %v397_v1 = vmax.f32 %v256_v55, 0.0  ;;  %v301_v2 = vadd.f32 %v300_v63, %v103_v48  ;;  %v399_v6 = vmax.f32 %v299_v59, 0.0  ;;  %v3175_v48 = vld [vmem:[#allocation4 + $0x6a0] ss:$16 sps:$4 sm:$0xff]   ;;  %v3189_v55 = vld [vmem:[#allocation4 + $0x664] ss:$16 sps:$4 sm:$0xff]  }
  0xfc   :  { %v3645_v3 = vpop.f32.mrf.mxu0  ;;  %v3648_v8 = vpop.f32.mrf.mxu1  ;;  %v3184_v56 = vld [vmem:[#allocation4 + $0x460] ss:$16 sps:$4 sm:$0xff]   ;;  %v3192_v58 = vld [vmem:[#allocation4 + $0x444] ss:$16 sps:$4 sm:$0xff]  }
  0xfd   :  { %v398_v7 = vmax.f32 %v258_v62, 0.0  ;;  %v400_v11 = vmax.f32 %v301_v2, 0.0  ;;  %v3652_v18 = vpack.c.bf16 %v397_v1, %v389_v9  ;;  %v3658_v24 = vpack.c.bf16 %v399_v6, %v391_v13  ;;  %v3195_v59 = vld [vmem:[#allocation4 + $0x644] ss:$16 sps:$4 sm:$0xff]   ;;  %v3190_v60 = vld [vmem:[#allocation4 + $0x440] ss:$16 sps:$4 sm:$0xff]  }
  0xfe   :  { %v339_v12 = vpop.f32.mrf.mxu0  ;;  %v382_v17 = vpop.f32.mrf.mxu1  ;;  %v3198_v62 = vld [vmem:[#allocation4 + $0x424] ss:$16 sps:$4 sm:$0xff]   ;;  %v3199_v1 = vld [vmem:[#allocation4 + $0x620] ss:$16 sps:$4 sm:$0xff]  }
  0xff   :  { %v3650_v14 = vpack.c.bf16 %v398_v7, %v390_v5  ;;  %v340_v16 = vadd.f32 %v339_v12, %v111_v0  ;;  %v3654_v19 = vpack.c.bf16 %v400_v11, %v392_v10  ;;  %v383_v23 = vadd.f32 %v382_v17, %v119_v4  ;;  %v3201_v63 = vld [vmem:[#allocation4 + $0x624] ss:$16 sps:$4 sm:$0xff]   ;;  %v3202_v5 = vld [vmem:[#allocation4 + $0x400] ss:$16 sps:$4 sm:$0xff]  }
 0x100   :  { %v3656_v22 = vpop.f32.mrf.mxu0  ;;  %v3661_v26 = vpop.f32.mrf.mxu1  ;;  %v3204_v2 = vld [vmem:[#allocation4 + $0x404] ss:$16 sps:$4 sm:$0xff]   ;;  %v3205_v6 = vld [vmem:[#allocation4 + $0x600] ss:$16 sps:$4 sm:$0xff]  }
 0x101   :  { %2003 = vmatprep.mubr.bf16.mxu0 %v3650_v14  ;;  %2046 = vmatprep.mubr.bf16.mxu1 %v3654_v19  ;;  %v394_v29 = vmax.f32 %v340_v16, 0.0  ;;  %v396_v34 = vmax.f32 %v383_v23, 0.0  ;;  %v3210_v7 = vld [vmem:[#allocation4 + $0x5e4] ss:$16 sps:$4 sm:$0xff]   ;;  %v3208_v10 = vld [vmem:[#allocation4 + $0x5e0] ss:$16 sps:$4 sm:$0xff]  }
 0x102   :  { %2004 = vmatmul.mubr.bf16.vlgmr.msra.gmra.mxu0 %v3652_v18  ;;  %v343_v27 = vpop.f32.mrf.mxu0  ;;  %2047 = vmatmul.mubr.bf16.vlgmr.msra.gmra.mxu1 %v3658_v24  ;;  %v386_v31 = vpop.f32.mrf.mxu1  ;;  %v3213_v9 = vld [vmem:[#allocation4 + $0x7e4] ss:$16 sps:$4 sm:$0xff]   ;;  %v3211_v11 = vld [vmem:[#allocation4 + $0x7e0] ss:$16 sps:$4 sm:$0xff]  }
 0x103   :  { %2058 = vmatpush1.bf16.msra.mxu0 %v3160_v15  ;;  %v344_v30 = vadd.f32 %v343_v27, %v111_v0  ;;  %2101 = vmatpush1.bf16.msra.mxu1 %v3163_v20  ;;  %v387_v35 = vadd.f32 %v386_v31, %v119_v4  ;;  %v3196_v0 = vld [vmem:[#allocation4 + $0x420] ss:$16 sps:$4 sm:$0xff]   ;;  %v3207_v4 = vld [vmem:[#allocation4 + $0x604] ss:$16 sps:$4 sm:$0xff]  }
 0x104   :  { %2059 = vmatprep.subr.bf16.mxu0 %v3168_v21  ;;  %2102 = vmatprep.subr.bf16.mxu1 %v3171_v25  ;;  %v3216_v12 = vld [vmem:[#allocation4 + $0x5c4] ss:$16 sps:$4 sm:$0xff]   ;;  %v3214_v15 = vld [vmem:[#allocation4 + $0x5c0] ss:$16 sps:$4 sm:$0xff]  }
 0x105   :  { %v402_v44 = vmax.f32 %v344_v30, 0.0  ;;  %v404_v45 = vmax.f32 %v387_v35, 0.0  ;;  %v3219_v13 = vld [vmem:[#allocation4 + $0x7c4] ss:$16 sps:$4 sm:$0xff]   ;;  %v3217_v16 = vld [vmem:[#allocation4 + $0x7c0] ss:$16 sps:$4 sm:$0xff]  }
 0x106   :  { %v3222_v17 = vld [vmem:[#allocation4 + $0x5a4] ss:$16 sps:$4 sm:$0xff]   ;;  %v3220_v21 = vld [vmem:[#allocation4 + $0x5a0] ss:$16 sps:$4 sm:$0xff]  }
 0x107   :  { %2060 = vmatpush1.bf16.msra.mxu0 %v3166_v28  ;;  %v3666_v47 = vpack.c.bf16 %v402_v44, %v394_v29  ;;  %2103 = vmatpush1.bf16.msra.mxu1 %v3169_v32  ;;  %v3668_v50 = vpack.c.bf16 %v404_v45, %v396_v34  ;;  %v3225_v20 = vld [vmem:[#allocation4 + $0x7a4] ss:$16 sps:$4 sm:$0xff]   ;;  %v3223_v23 = vld [vmem:[#allocation4 + $0x7a0] ss:$16 sps:$4 sm:$0xff]  }
 0x108   :  { %2061 = vmatprep.subr.bf16.mxu0 %v3174_v33  ;;  %2104 = vmatprep.subr.bf16.mxu1 %v3177_v43  ;;  %v3228_v25 = vld [vmem:[#allocation4 + $0x584] ss:$16 sps:$4 sm:$0xff]   ;;  %v3226_v28 = vld [vmem:[#allocation4 + $0x580] ss:$16 sps:$4 sm:$0xff]   ;;  %v106_v33 = vsub.s32 4, %v3619_v37  ;;  %v114_v43 = vsub.s32 6, %v3619_v37 }
 0x109   :  { %2089 = vmatprep.mubr.bf16.mxu0 %v3666_v47  ;;  %2132 = vmatprep.mubr.bf16.mxu1 %v3668_v50  ;;  %v3231_v27 = vld [vmem:[#allocation4 + $0x784] ss:$16 sps:$4 sm:$0xff]   ;;  %v3229_v29 = vld [vmem:[#allocation4 + $0x780] ss:$16 sps:$4 sm:$0xff]  }
 0x10a   :  { %v3234_v30 = vld [vmem:[#allocation4 + $0x564] ss:$16 sps:$4 sm:$0xff]   ;;  %v3232_v32 = vld [vmem:[#allocation4 + $0x560] ss:$16 sps:$4 sm:$0xff]  }
 0x10b   :  { %2062 = vmatpush1.bf16.msra.mxu0 %v3172_v46  ;;  %2105 = vmatpush1.bf16.msra.mxu1 %v3175_v48  ;;  %v3237_v31 = vld [vmem:[#allocation4 + $0x764] ss:$16 sps:$4 sm:$0xff]   ;;  %v3235_v34 = vld [vmem:[#allocation4 + $0x760] ss:$16 sps:$4 sm:$0xff]   ;;  %v107_v46 = vrot.slane %v3627_v41, %v106_v33  ;;  %v3295_v33 = vld [vmem:[#allocation4 + $0x228] ss:$16 sps:$4 sm:$0xff]  }
 0x10c   :  { %2063 = vmatprep.subr.bf16.mxu0 %v3180_v49  ;;  %2106 = vmatprep.subr.bf16.mxu1 %v3183_v51  ;;  %v3240_v35 = vld [vmem:[#allocation4 + $0x544] ss:$16 sps:$4 sm:$0xff]   ;;  %v3238_v45 = vld [vmem:[#allocation4 + $0x540] ss:$16 sps:$4 sm:$0xff]   ;;  %v115_v51 = vrot.slane %v3627_v41, %v114_v43  ;;  %v3298_v43 = vld [vmem:[#allocation4 + $0x8] ss:$16 sps:$4 sm:$0xff]  }
 0x10d   :  { %v3243_v44 = vld [vmem:[#allocation4 + $0x744] ss:$16 sps:$4 sm:$0xff]   ;;  %v3241_v48 = vld [vmem:[#allocation4 + $0x740] ss:$16 sps:$4 sm:$0xff]  }
 0x10e   :  { %v3246_v49 = vld [vmem:[#allocation4 + $0x524] ss:$16 sps:$4 sm:$0xff]   ;;  %v3250_v41 = vld [vmem:[#allocation4 + $0x500] ss:$16 sps:$4 sm:$0xff]  }
 0x10f   :  { %2064 = vmatpush1.bf16.msra.mxu0 %v3178_v52  ;;  %2107 = vmatpush1.bf16.msra.mxu1 %v3181_v53  ;;  %v3249_v52 = vld [vmem:[#allocation4 + $0x724] ss:$16 sps:$4 sm:$0xff]   ;;  %v3244_v53 = vld [vmem:[#allocation4 + $0x520] ss:$16 sps:$4 sm:$0xff]  }
 0x110   :  { %2065 = vmatprep.subr.bf16.mxu0 %v3186_v54  ;;  %2108 = vmatprep.subr.bf16.mxu1 %v3189_v55  ;;  %v338_v54 = vadd.f32 %v3645_v3, %v107_v46  ;;  %v342_v55 = vadd.f32 %v3656_v22, %v107_v46  ;;  %v3258_v3 = vld [vmem:[#allocation4 + $0xec] ss:$16 sps:$4 sm:$0xff]  }
 0x111   :  { %v3309_v46 = vld [vmem:[#allocation4 + $0x3ec] ss:$16 sps:$4 sm:$0xff]  }
 0x113   :  { %2066 = vmatpush1.bf16.msra.mxu0 %v3184_v56  ;;  %2109 = vmatpush1.bf16.msra.mxu1 %v3187_v57  ;;  %v3247_v56 = vld [vmem:[#allocation4 + $0x720] ss:$16 sps:$4 sm:$0xff]   ;;  %v3252_v57 = vld [vmem:[#allocation4 + $0x504] ss:$16 sps:$4 sm:$0xff]  }
 0x114   :  { %2067 = vmatprep.subr.bf16.mxu0 %v3192_v58  ;;  %2110 = vmatprep.subr.bf16.mxu1 %v3195_v59  ;;  %v381_v58 = vadd.f32 %v3648_v8, %v115_v51  ;;  %v385_v59 = vadd.f32 %v3661_v26, %v115_v51  ;;  %v3259_v8 = vld [vmem:[#allocation4 + $0x2e8] ss:$16 sps:$4 sm:$0xff]   ;;  %v3312_v51 = vld [vmem:[#allocation4 + $0x1cc] ss:$16 sps:$4 sm:$0xff]  }
 0x116   :  { %v403_v22 = vmax.f32 %v385_v59, 0.0  ;;  %v3324_v59 = vld [vmem:[#allocation4 + $0x18c] ss:$16 sps:$4 sm:$0xff]  }
 0x117   :  { %2068 = vmatpush1.bf16.msra.mxu0 %v3190_v60  ;;  %2111 = vmatpush1.bf16.msra.mxu1 %v3193_v61  ;;  %v3255_v60 = vld [vmem:[#allocation4 + $0x704] ss:$16 sps:$4 sm:$0xff]   ;;  %v393_v61 = vmax.f32 %v338_v54, 0.0  ;;  %v3313_v54 = vld [vmem:[#allocation4 + $0x3c8] ss:$16 sps:$4 sm:$0xff]  }
 0x118   :  { %2069 = vmatprep.subr.bf16.mxu0 %v3198_v62  ;;  %2112 = vmatprep.subr.bf16.mxu1 %v3201_v63  ;;  %v401_v62 = vmax.f32 %v342_v55, 0.0  ;;  %v3253_v63 = vld [vmem:[#allocation4 + $0x700] ss:$16 sps:$4 sm:$0xff]   ;;  %v3318_v55 = vld [vmem:[#allocation4 + $0x1ac] ss:$16 sps:$4 sm:$0xff]  }
 0x11b   :  { %2070 = vmatpush1.bf16.msra.mxu0 %v3196_v0  ;;  %2113 = vmatpush1.bf16.msra.mxu1 %v3199_v1  ;;  %v395_v0 = vmax.f32 %v381_v58, 0.0  ;;  %v3261_v1 = vld [vmem:[#allocation4 + $0x2ec] ss:$16 sps:$4 sm:$0xff]   ;;  %v3319_v58 = vld [vmem:[#allocation4 + $0x3a8] ss:$16 sps:$4 sm:$0xff]  }
 0x11c   :  { %2071 = vmatprep.subr.bf16.mxu0 %v3204_v2  ;;  %2114 = vmatprep.subr.bf16.mxu1 %v3207_v4  ;;  %v3256_v2 = vld [vmem:[#allocation4 + $0xe8] ss:$16 sps:$4 sm:$0xff]   ;;  %v3680_v4 = vpack.c.bf16 %v401_v62, %v393_v61  ;;  %v3330_v62 = vld [vmem:[#allocation4 + $0x16c] ss:$16 sps:$4 sm:$0xff]  }
 0x11d   :  { %v3682_v26 = vpack.c.bf16 %v403_v22, %v395_v0  ;;  %v3325_v61 = vld [vmem:[#allocation4 + $0x388] ss:$16 sps:$4 sm:$0xff]   ;;  %v3336_v22 = vld [vmem:[#allocation4 + $0x14c] ss:$16 sps:$4 sm:$0xff]  }
 0x11e   :  { %v3331_v0 = vld [vmem:[#allocation4 + $0x368] ss:$16 sps:$4 sm:$0xff]  }
 0x11f   :  { %2072 = vmatpush1.bf16.msra.mxu0 %v3202_v5  ;;  %2115 = vmatpush1.bf16.msra.mxu1 %v3205_v6  ;;  %v3264_v5 = vld [vmem:[#allocation4 + $0xcc] ss:$16 sps:$4 sm:$0xff]  }
 0x120   :  { %2073 = vmatprep.subr.bf16.mxu0 %v3210_v7  ;;  %2116 = vmatprep.subr.bf16.mxu1 %v3213_v9  ;;  %v3267_v6 = vld [vmem:[#allocation4 + $0x2cc] ss:$16 sps:$4 sm:$0xff]   ;;  %v3262_v7 = vld [vmem:[#allocation4 + $0xc8] ss:$16 sps:$4 sm:$0xff]  }
 0x121   :  { %v3265_v9 = vld [vmem:[#allocation4 + $0x2c8] ss:$16 sps:$4 sm:$0xff]  }
 0x123   :  { %2074 = vmatpush2.bf16.msra.mxu0 %v3208_v10  ;;  %2117 = vmatpush2.bf16.msra.mxu1 %v3211_v11  ;;  %v3270_v10 = vld [vmem:[#allocation4 + $0xac] ss:$16 sps:$4 sm:$0xff]  }
 0x124   :  { %2075 = vmatprep.subr.bf16.mxu0 %v3216_v12  ;;  %2118 = vmatprep.subr.bf16.mxu1 %v3219_v13  ;;  %v3273_v11 = vld [vmem:[#allocation4 + $0x2ac] ss:$16 sps:$4 sm:$0xff]   ;;  %v3268_v12 = vld [vmem:[#allocation4 + $0xa8] ss:$16 sps:$4 sm:$0xff]  }
 0x125   :  { %v3271_v13 = vld [vmem:[#allocation4 + $0x2a8] ss:$16 sps:$4 sm:$0xff]  }
 0x127   :  { %2076 = vmatpush2.bf16.msra.mxu0 %v3214_v15  ;;  %2119 = vmatpush2.bf16.msra.mxu1 %v3217_v16  ;;  %v3276_v15 = vld [vmem:[#allocation4 + $0x8c] ss:$16 sps:$4 sm:$0xff]  }
 0x128   :  { %2077 = vmatprep.subr.bf16.mxu0 %v3222_v17  ;;  %2120 = vmatprep.subr.bf16.mxu1 %v3225_v20  ;;  %v3279_v16 = vld [vmem:[#allocation4 + $0x28c] ss:$16 sps:$4 sm:$0xff]   ;;  %v3274_v17 = vld [vmem:[#allocation4 + $0x88] ss:$16 sps:$4 sm:$0xff]  }
 0x129   :  { %v3282_v20 = vld [vmem:[#allocation4 + $0x6c] ss:$16 sps:$4 sm:$0xff]  }
 0x12b   :  { %2078 = vmatpush2.bf16.msra.mxu0 %v3220_v21  ;;  %2121 = vmatpush2.bf16.msra.mxu1 %v3223_v23  ;;  %v3285_v21 = vld [vmem:[#allocation4 + $0x26c] ss:$16 sps:$4 sm:$0xff]   ;;  %v3283_v23 = vld [vmem:[#allocation4 + $0x268] ss:$16 sps:$4 sm:$0xff]  }
 0x12c   :  { %2079 = vmatprep.subr.bf16.mxu0 %v3228_v25  ;;  %2122 = vmatprep.subr.bf16.mxu1 %v3231_v27  ;;  %v3288_v25 = vld [vmem:[#allocation4 + $0x4c] ss:$16 sps:$4 sm:$0xff]  }
 0x12d   :  { %v3291_v27 = vld [vmem:[#allocation4 + $0x24c] ss:$16 sps:$4 sm:$0xff]  }
 0x12f   :  { %2080 = vmatpush2.bf16.msra.mxu0 %v3226_v28  ;;  %2123 = vmatpush2.bf16.msra.mxu1 %v3229_v29  ;;  %v3286_v28 = vld [vmem:[#allocation4 + $0x48] ss:$16 sps:$4 sm:$0xff]  }
 0x130   :  { %2081 = vmatprep.subr.bf16.mxu0 %v3234_v30  ;;  %2124 = vmatprep.subr.bf16.mxu1 %v3237_v31  ;;  %v3289_v29 = vld [vmem:[#allocation4 + $0x248] ss:$16 sps:$4 sm:$0xff]   ;;  %v3294_v30 = vld [vmem:[#allocation4 + $0x2c] ss:$16 sps:$4 sm:$0xff]  }
 0x131   :  { %v3297_v31 = vld [vmem:[#allocation4 + $0x22c] ss:$16 sps:$4 sm:$0xff]  }
 0x133   :  { %2082 = vmatpush2.bf16.msra.mxu0 %v3232_v32  ;;  %2125 = vmatpush2.bf16.msra.mxu1 %v3235_v34  ;;  %v3292_v32 = vld [vmem:[#allocation4 + $0x28] ss:$16 sps:$4 sm:$0xff]   ;;  %v3300_v34 = vld [vmem:[#allocation4 + $0xc] ss:$16 sps:$4 sm:$0xff]  }
 0x134   :  { %2083 = vmatprep.subr.bf16.mxu0 %v3240_v35  ;;  %2126 = vmatprep.subr.bf16.mxu1 %v3243_v44  ;;  %v3303_v35 = vld [vmem:[#allocation4 + $0x20c] ss:$16 sps:$4 sm:$0xff]   ;;  %v3301_v44 = vld [vmem:[#allocation4 + $0x208] ss:$16 sps:$4 sm:$0xff]  }
 0x137   :  { %2084 = vmatpush2.bf16.msra.mxu0 %v3238_v45  ;;  %2127 = vmatpush2.bf16.msra.mxu1 %v3241_v48  ;;  %v3306_v45 = vld [vmem:[#allocation4 + $0x1ec] ss:$16 sps:$4 sm:$0xff]   ;;  %v3304_v48 = vld [vmem:[#allocation4 + $0x1e8] ss:$16 sps:$4 sm:$0xff]  }
 0x138   :  { %2085 = vmatprep.subr.bf16.mxu0 %v3246_v49  ;;  %2128 = vmatprep.subr.bf16.mxu1 %v3249_v52  ;;  %v3307_v49 = vld [vmem:[#allocation4 + $0x3e8] ss:$16 sps:$4 sm:$0xff]   ;;  %v3315_v52 = vld [vmem:[#allocation4 + $0x3cc] ss:$16 sps:$4 sm:$0xff]  }
 0x13b   :  { %2086 = vmatpush2.bf16.msra.mxu0 %v3244_v53  ;;  %2129 = vmatpush2.bf16.msra.mxu1 %v3247_v56  ;;  %v3310_v53 = vld [vmem:[#allocation4 + $0x1c8] ss:$16 sps:$4 sm:$0xff]   ;;  %v3321_v56 = vld [vmem:[#allocation4 + $0x3ac] ss:$16 sps:$4 sm:$0xff]  }
 0x13c   :  { %2087 = vmatprep.subr.bf16.mxu0 %v3252_v57  ;;  %2130 = vmatprep.subr.bf16.mxu1 %v3255_v60  ;;  %v3316_v57 = vld [vmem:[#allocation4 + $0x1a8] ss:$16 sps:$4 sm:$0xff]   ;;  %v3327_v60 = vld [vmem:[#allocation4 + $0x38c] ss:$16 sps:$4 sm:$0xff]  }
 0x13f   :  { %2088 = vmatpush2.bf16.msra.mxu0 %v3250_v41  ;;  %2131 = vmatpush2.bf16.msra.mxu1 %v3253_v63  ;;  %v3322_v41 = vld [vmem:[#allocation4 + $0x188] ss:$16 sps:$4 sm:$0xff]   ;;  %v3333_v63 = vld [vmem:[#allocation4 + $0x36c] ss:$16 sps:$4 sm:$0xff]  }
 0x140   :  { %2143 = vmatprep.subr.bf16.mxu0 %v3258_v3  ;;  %2186 = vmatprep.subr.bf16.mxu1 %v3261_v1  ;;  %v3328_v3 = vld [vmem:[#allocation4 + $0x168] ss:$16 sps:$4 sm:$0xff]   ;;  %v3339_v1 = vld [vmem:[#allocation4 + $0x34c] ss:$16 sps:$4 sm:$0xff]  }
 0x142   :  { %2090 = vmatmul.mubr.bf16.vlgmr.msra.gmra.mxu0 %v3680_v4  ;;  %2133 = vmatmul.mubr.bf16.vlgmr.msra.gmra.mxu1 %v3682_v26 }
 0x143   :  { %2144 = vmatpush1.bf16.msra.mxu0 %v3256_v2  ;;  %2175 = vmatprep.mubr.bf16.mxu0 %v3650_v14  ;;  %v3277_v14 = vld [vmem:[#allocation4 + $0x288] ss:$16 sps:$4 sm:$0xff]  }
 0x144   :  { %2187 = vmatpush1.bf16.msra.mxu1 %v3259_v8  ;;  %2218 = vmatprep.mubr.bf16.mxu1 %v3654_v19  ;;  %v3280_v19 = vld [vmem:[#allocation4 + $0x68] ss:$16 sps:$4 sm:$0xff]  }
 0x145   :  { %2145 = vmatprep.subr.bf16.mxu0 %v3264_v5  ;;  %2188 = vmatprep.subr.bf16.mxu1 %v3267_v6  ;;  %v3334_v2 = vld [vmem:[#allocation4 + $0x148] ss:$16 sps:$4 sm:$0xff]   ;;  %v3342_v5 = vld [vmem:[#allocation4 + $0x12c] ss:$16 sps:$4 sm:$0xff]  }
 0x146   :  { %v3337_v8 = vld [vmem:[#allocation4 + $0x348] ss:$16 sps:$4 sm:$0xff]   ;;  %v3345_v6 = vld [vmem:[#allocation4 + $0x32c] ss:$16 sps:$4 sm:$0xff]  }
 0x147   :  { %2146 = vmatpush1.bf16.msra.mxu0 %v3262_v7  ;;  %v3340_v7 = vld [vmem:[#allocation4 + $0x128] ss:$16 sps:$4 sm:$0xff]  }
 0x148   :  { %2189 = vmatpush1.bf16.msra.mxu1 %v3265_v9  ;;  %2147 = vmatprep.subr.bf16.mxu0 %v3270_v10  ;;  %v3343_v9 = vld [vmem:[#allocation4 + $0x328] ss:$16 sps:$4 sm:$0xff]   ;;  %v3348_v10 = vld [vmem:[#allocation4 + $0x10c] ss:$16 sps:$4 sm:$0xff]  }
 0x149   :  { %2190 = vmatprep.subr.bf16.mxu1 %v3273_v11  ;;  %v3351_v11 = vld [vmem:[#allocation4 + $0x30c] ss:$16 sps:$4 sm:$0xff]  }
 0x14b   :  { %2148 = vmatpush1.bf16.msra.mxu0 %v3268_v12  ;;  %v3346_v12 = vld [vmem:[#allocation4 + $0x108] ss:$16 sps:$4 sm:$0xff]  }
 0x14c   :  { %2191 = vmatpush1.bf16.msra.mxu1 %v3271_v13  ;;  %2149 = vmatprep.subr.bf16.mxu0 %v3276_v15  ;;  %v3349_v13 = vld [vmem:[#allocation4 + $0x308] ss:$16 sps:$4 sm:$0xff]   ;;  %v3354_v15 = vld [vmem:[#allocation4 + $0x4ec] ss:$16 sps:$4 sm:$0xff]  }
 0x14d   :  { %2192 = vmatprep.subr.bf16.mxu1 %v3279_v16  ;;  %v3357_v16 = vld [vmem:[#allocation4 + $0x6ec] ss:$16 sps:$4 sm:$0xff]  }
 0x14f   :  { %2150 = vmatpush1.bf16.msra.mxu0 %v3274_v17  ;;  %v3352_v17 = vld [vmem:[#allocation4 + $0x4e8] ss:$16 sps:$4 sm:$0xff]  }
 0x150   :  { %2193 = vmatpush1.bf16.msra.mxu1 %v3277_v14  ;;  %2151 = vmatprep.subr.bf16.mxu0 %v3282_v20  ;;  %v3355_v14 = vld [vmem:[#allocation4 + $0x6e8] ss:$16 sps:$4 sm:$0xff]   ;;  %v3360_v20 = vld [vmem:[#allocation4 + $0x4cc] ss:$16 sps:$4 sm:$0xff]  }
 0x151   :  { %2194 = vmatprep.subr.bf16.mxu1 %v3285_v21  ;;  %v3363_v21 = vld [vmem:[#allocation4 + $0x6cc] ss:$16 sps:$4 sm:$0xff]  }
 0x153   :  { %2152 = vmatpush1.bf16.msra.mxu0 %v3280_v19  ;;  %v3358_v19 = vld [vmem:[#allocation4 + $0x4c8] ss:$16 sps:$4 sm:$0xff]  }
 0x154   :  { %2195 = vmatpush1.bf16.msra.mxu1 %v3283_v23  ;;  %2153 = vmatprep.subr.bf16.mxu0 %v3288_v25  ;;  %v3361_v23 = vld [vmem:[#allocation4 + $0x6c8] ss:$16 sps:$4 sm:$0xff]   ;;  %v3366_v25 = vld [vmem:[#allocation4 + $0x4ac] ss:$16 sps:$4 sm:$0xff]  }
 0x155   :  { %2196 = vmatprep.subr.bf16.mxu1 %v3291_v27  ;;  %v3369_v27 = vld [vmem:[#allocation4 + $0x6ac] ss:$16 sps:$4 sm:$0xff]  }
 0x157   :  { %2154 = vmatpush1.bf16.msra.mxu0 %v3286_v28  ;;  %v3364_v28 = vld [vmem:[#allocation4 + $0x4a8] ss:$16 sps:$4 sm:$0xff]  }
 0x158   :  { %2197 = vmatpush1.bf16.msra.mxu1 %v3289_v29  ;;  %2155 = vmatprep.subr.bf16.mxu0 %v3294_v30  ;;  %v3372_v29 = vld [vmem:[#allocation4 + $0x48c] ss:$16 sps:$4 sm:$0xff]   ;;  %v3370_v30 = vld [vmem:[#allocation4 + $0x488] ss:$16 sps:$4 sm:$0xff]  }
 0x159   :  { %2198 = vmatprep.subr.bf16.mxu1 %v3297_v31  ;;  %v3378_v31 = vld [vmem:[#allocation4 + $0x46c] ss:$16 sps:$4 sm:$0xff]  }
 0x15b   :  { %2156 = vmatpush1.bf16.msra.mxu0 %v3292_v32  ;;  %v3381_v32 = vld [vmem:[#allocation4 + $0x66c] ss:$16 sps:$4 sm:$0xff]  }
 0x15c   :  { %2199 = vmatpush1.bf16.msra.mxu1 %v3295_v33  ;;  %2157 = vmatprep.subr.bf16.mxu0 %v3300_v34  ;;  %v3379_v33 = vld [vmem:[#allocation4 + $0x668] ss:$16 sps:$4 sm:$0xff]   ;;  %v3384_v34 = vld [vmem:[#allocation4 + $0x44c] ss:$16 sps:$4 sm:$0xff]  }
 0x15d   :  { %2200 = vmatprep.subr.bf16.mxu1 %v3303_v35  ;;  %v3387_v35 = vld [vmem:[#allocation4 + $0x64c] ss:$16 sps:$4 sm:$0xff]  }
 0x15f   :  { %2158 = vmatpush1.bf16.msra.mxu0 %v3298_v43  ;;  %v3382_v43 = vld [vmem:[#allocation4 + $0x448] ss:$16 sps:$4 sm:$0xff]  }
 0x160   :  { %2201 = vmatpush1.bf16.msra.mxu1 %v3301_v44  ;;  %2159 = vmatprep.subr.bf16.mxu0 %v3306_v45  ;;  %v3385_v44 = vld [vmem:[#allocation4 + $0x648] ss:$16 sps:$4 sm:$0xff]   ;;  %v3390_v45 = vld [vmem:[#allocation4 + $0x42c] ss:$16 sps:$4 sm:$0xff]  }
 0x161   :  { %2202 = vmatprep.subr.bf16.mxu1 %v3309_v46  ;;  %v3393_v46 = vld [vmem:[#allocation4 + $0x62c] ss:$16 sps:$4 sm:$0xff]  }
 0x163   :  { %2160 = vmatpush2.bf16.msra.mxu0 %v3304_v48  ;;  %v3388_v48 = vld [vmem:[#allocation4 + $0x428] ss:$16 sps:$4 sm:$0xff]  }
 0x164   :  { %2203 = vmatpush2.bf16.msra.mxu1 %v3307_v49  ;;  %2161 = vmatprep.subr.bf16.mxu0 %v3312_v51  ;;  %v3391_v49 = vld [vmem:[#allocation4 + $0x628] ss:$16 sps:$4 sm:$0xff]   ;;  %v3396_v51 = vld [vmem:[#allocation4 + $0x40c] ss:$16 sps:$4 sm:$0xff]  }
 0x165   :  { %2204 = vmatprep.subr.bf16.mxu1 %v3315_v52  ;;  %v3399_v52 = vld [vmem:[#allocation4 + $0x60c] ss:$16 sps:$4 sm:$0xff]  }
 0x167   :  { %2162 = vmatpush2.bf16.msra.mxu0 %v3310_v53  ;;  %v3394_v53 = vld [vmem:[#allocation4 + $0x408] ss:$16 sps:$4 sm:$0xff]  }
 0x168   :  { %2205 = vmatpush2.bf16.msra.mxu1 %v3313_v54  ;;  %2163 = vmatprep.subr.bf16.mxu0 %v3318_v55  ;;  %v3397_v54 = vld [vmem:[#allocation4 + $0x608] ss:$16 sps:$4 sm:$0xff]   ;;  %v3402_v55 = vld [vmem:[#allocation4 + $0x5ec] ss:$16 sps:$4 sm:$0xff]  }
 0x169   :  { %2206 = vmatprep.subr.bf16.mxu1 %v3321_v56  ;;  %v3405_v56 = vld [vmem:[#allocation4 + $0x7ec] ss:$16 sps:$4 sm:$0xff]  }
 0x16b   :  { %2164 = vmatpush2.bf16.msra.mxu0 %v3316_v57  ;;  %v3400_v57 = vld [vmem:[#allocation4 + $0x5e8] ss:$16 sps:$4 sm:$0xff]  }
 0x16c   :  { %2207 = vmatpush2.bf16.msra.mxu1 %v3319_v58  ;;  %2165 = vmatprep.subr.bf16.mxu0 %v3324_v59  ;;  %v3403_v58 = vld [vmem:[#allocation4 + $0x7e8] ss:$16 sps:$4 sm:$0xff]   ;;  %v3408_v59 = vld [vmem:[#allocation4 + $0x5cc] ss:$16 sps:$4 sm:$0xff]  }
 0x16d   :  { %2208 = vmatprep.subr.bf16.mxu1 %v3327_v60  ;;  %v3411_v60 = vld [vmem:[#allocation4 + $0x7cc] ss:$16 sps:$4 sm:$0xff]  }
 0x16f   :  { %2166 = vmatpush2.bf16.msra.mxu0 %v3322_v41  ;;  %v3406_v41 = vld [vmem:[#allocation4 + $0x5c8] ss:$16 sps:$4 sm:$0xff]  }
 0x170   :  { %2209 = vmatpush2.bf16.msra.mxu1 %v3325_v61  ;;  %2167 = vmatprep.subr.bf16.mxu0 %v3330_v62  ;;  %v3409_v61 = vld [vmem:[#allocation4 + $0x7c8] ss:$16 sps:$4 sm:$0xff]   ;;  %v3414_v62 = vld [vmem:[#allocation4 + $0x5ac] ss:$16 sps:$4 sm:$0xff]  }
 0x171   :  { %2210 = vmatprep.subr.bf16.mxu1 %v3333_v63  ;;  %v3417_v63 = vld [vmem:[#allocation4 + $0x7ac] ss:$16 sps:$4 sm:$0xff]  }
 0x173   :  { %2168 = vmatpush2.bf16.msra.mxu0 %v3328_v3  ;;  %v3412_v3 = vld [vmem:[#allocation4 + $0x5a8] ss:$16 sps:$4 sm:$0xff]  }
 0x174   :  { %2211 = vmatpush2.bf16.msra.mxu1 %v3331_v0  ;;  %2169 = vmatprep.subr.bf16.mxu0 %v3336_v22  ;;  %v3415_v0 = vld [vmem:[#allocation4 + $0x7a8] ss:$16 sps:$4 sm:$0xff]   ;;  %v3420_v22 = vld [vmem:[#allocation4 + $0x58c] ss:$16 sps:$4 sm:$0xff]  }
 0x175   :  { %2212 = vmatprep.subr.bf16.mxu1 %v3339_v1  ;;  %v3423_v1 = vld [vmem:[#allocation4 + $0x78c] ss:$16 sps:$4 sm:$0xff]  }
 0x177   :  { %2170 = vmatpush2.bf16.msra.mxu0 %v3334_v2  ;;  %v3418_v2 = vld [vmem:[#allocation4 + $0x588] ss:$16 sps:$4 sm:$0xff]  }
 0x178   :  { %2213 = vmatpush2.bf16.msra.mxu1 %v3337_v8  ;;  %2171 = vmatprep.subr.bf16.mxu0 %v3342_v5  ;;  %v3421_v8 = vld [vmem:[#allocation4 + $0x788] ss:$16 sps:$4 sm:$0xff]   ;;  %v3426_v5 = vld [vmem:[#allocation4 + $0x56c] ss:$16 sps:$4 sm:$0xff]  }
 0x179   :  { %2214 = vmatprep.subr.bf16.mxu1 %v3345_v6  ;;  %v3429_v6 = vld [vmem:[#allocation4 + $0x76c] ss:$16 sps:$4 sm:$0xff]  }
 0x17b   :  { %2172 = vmatpush2.bf16.msra.mxu0 %v3340_v7  ;;  %v3424_v7 = vld [vmem:[#allocation4 + $0x568] ss:$16 sps:$4 sm:$0xff]  }
 0x17c   :  { %2215 = vmatpush2.bf16.msra.mxu1 %v3343_v9  ;;  %2173 = vmatprep.subr.bf16.mxu0 %v3348_v10  ;;  %v3427_v9 = vld [vmem:[#allocation4 + $0x768] ss:$16 sps:$4 sm:$0xff]   ;;  %v3432_v10 = vld [vmem:[#allocation4 + $0x54c] ss:$16 sps:$4 sm:$0xff]  }
 0x17d   :  { %2216 = vmatprep.subr.bf16.mxu1 %v3351_v11  ;;  %v3435_v11 = vld [vmem:[#allocation4 + $0x74c] ss:$16 sps:$4 sm:$0xff]  }
 0x17f   :  { %2174 = vmatpush2.bf16.msra.mxu0 %v3346_v12  ;;  %v3430_v12 = vld [vmem:[#allocation4 + $0x548] ss:$16 sps:$4 sm:$0xff]  }
 0x180   :  { %2217 = vmatpush2.bf16.msra.mxu1 %v3349_v13  ;;  %2229 = vmatprep.subr.bf16.mxu0 %v3354_v15  ;;  %v3433_v13 = vld [vmem:[#allocation4 + $0x748] ss:$16 sps:$4 sm:$0xff]   ;;  %v3438_v15 = vld [vmem:[#allocation4 + $0x52c] ss:$16 sps:$4 sm:$0xff]  }
 0x181   :  { %2272 = vmatprep.subr.bf16.mxu1 %v3357_v16  ;;  %v3441_v16 = vld [vmem:[#allocation4 + $0x72c] ss:$16 sps:$4 sm:$0xff]  }
 0x182   :  { %2176 = vmatmul.mubr.bf16.vlgmr.msra.gmra.mxu0 %v3652_v18  ;;  %v3367_v18 = vld [vmem:[#allocation4 + $0x6a8] ss:$16 sps:$4 sm:$0xff]  }
 0x183   :  { %2219 = vmatmul.mubr.bf16.vlgmr.msra.gmra.mxu1 %v3658_v24  ;;  %2230 = vmatpush1.bf16.msra.mxu0 %v3352_v17  ;;  %v3375_v24 = vld [vmem:[#allocation4 + $0x68c] ss:$16 sps:$4 sm:$0xff]   ;;  %v3436_v17 = vld [vmem:[#allocation4 + $0x528] ss:$16 sps:$4 sm:$0xff]  }
 0x184   :  { %2261 = vmatprep.mubr.bf16.mxu0 %v3666_v47  ;;  %2273 = vmatpush1.bf16.msra.mxu1 %v3355_v14  ;;  %v3373_v47 = vld [vmem:[#allocation4 + $0x688] ss:$16 sps:$4 sm:$0xff]  }
 0x185   :  { %2304 = vmatprep.mubr.bf16.mxu1 %v3668_v50  ;;  %2231 = vmatprep.subr.bf16.mxu0 %v3360_v20  ;;  %v3376_v50 = vld [vmem:[#allocation4 + $0x468] ss:$16 sps:$4 sm:$0xff]   ;;  %v3444_v20 = vld [vmem:[#allocation4 + $0x50c] ss:$16 sps:$4 sm:$0xff]  }
 0x186   :  { %2274 = vmatprep.subr.bf16.mxu1 %v3363_v21  ;;  %v3439_v14 = vld [vmem:[#allocation4 + $0x728] ss:$16 sps:$4 sm:$0xff]   ;;  %v3447_v21 = vld [vmem:[#allocation4 + $0x70c] ss:$16 sps:$4 sm:$0xff]  }
 0x187   :  { %2232 = vmatpush1.bf16.msra.mxu0 %v3358_v19  ;;  %v3442_v19 = vld [vmem:[#allocation4 + $0x508] ss:$16 sps:$4 sm:$0xff]  }
 0x188   :  { %2275 = vmatpush1.bf16.msra.mxu1 %v3361_v23  ;;  %2233 = vmatprep.subr.bf16.mxu0 %v3366_v25  ;;  %v3445_v23 = vld [vmem:[#allocation4 + $0x708] ss:$16 sps:$4 sm:$0xff]  }
 0x189   :  { %2276 = vmatprep.subr.bf16.mxu1 %v3369_v27  ;;  %v3448_v25 = vld [vmem:[#allocation6 + $0x78] sm:$0xff]  }
 0x18a   :  { %v3449_v27 = vld [vmem:[#allocation6 + $0x38] sm:$0xff]  }
 0x18b   :  { %2234 = vmatpush1.bf16.msra.mxu0 %v3364_v28  ;;  %v3450_v28 = vld [vmem:[#allocation6 + $0x70] sm:$0xff]  }
 0x18c   :  { %2277 = vmatpush1.bf16.msra.mxu1 %v3367_v18  ;;  %2235 = vmatprep.subr.bf16.mxu0 %v3372_v29  ;;  %v3451_v18 = vld [vmem:[#allocation6 + $0x30] sm:$0xff]   ;;  %v3452_v29 = vld [vmem:[#allocation6 + $0x68] sm:$0xff]  }
 0x18d   :  { %2278 = vmatprep.subr.bf16.mxu1 %v3375_v24  ;;  %v3453_v24 = vld [vmem:[#allocation6 + $0x28] sm:$0xff]  }
 0x18f   :  { %2236 = vmatpush1.bf16.msra.mxu0 %v3370_v30  ;;  %v3454_v30 = vld [vmem:[#allocation6 + $0x60] sm:$0xff]  }
 0x190   :  { %2279 = vmatpush1.bf16.msra.mxu1 %v3373_v47  ;;  %2237 = vmatprep.subr.bf16.mxu0 %v3378_v31  ;;  %v3455_v47 = vld [vmem:[#allocation6 + $0x20] sm:$0xff]   ;;  %v3464_v31 = vld [vmem:[#allocation6 + $0xf8] sm:$0xff]  }
 0x191   :  { %2280 = vmatprep.subr.bf16.mxu1 %v3381_v32  ;;  %v3465_v32 = vld [vmem:[#allocation6 + $0xb8] sm:$0xff]  }
 0x193   :  { %2238 = vmatpush1.bf16.msra.mxu0 %v3376_v50  ;;  %v3466_v50 = vld [vmem:[#allocation6 + $0xf0] sm:$0xff]  }
 0x194   :  { %2281 = vmatpush1.bf16.msra.mxu1 %v3379_v33  ;;  %2239 = vmatprep.subr.bf16.mxu0 %v3384_v34  ;;  %v3456_v33 = vld [vmem:[#allocation6 + $0x58] sm:$0xff]   ;;  %v3468_v34 = vld [vmem:[#allocation6 + $0xe8] sm:$0xff]  }
 0x195   :  { %2282 = vmatprep.subr.bf16.mxu1 %v3387_v35  ;;  %v3458_v35 = vld [vmem:[#allocation6 + $0x50] sm:$0xff]  }
 0x197   :  { %2240 = vmatpush1.bf16.msra.mxu0 %v3382_v43  ;;  %v3469_v43 = vld [vmem:[#allocation6 + $0xa8] sm:$0xff]  }
 0x198   :  { %2283 = vmatpush1.bf16.msra.mxu1 %v3385_v44  ;;  %2241 = vmatprep.subr.bf16.mxu0 %v3390_v45  ;;  %v3459_v44 = vld [vmem:[#allocation6 + $0x10] sm:$0xff]   ;;  %v3470_v45 = vld [vmem:[#allocation6 + $0xe0] sm:$0xff]  }
 0x199   :  { %2284 = vmatprep.subr.bf16.mxu1 %v3393_v46  ;;  %v3460_v46 = vld [vmem:[#allocation6 + $0x48] sm:$0xff]  }
 0x19b   :  { %2242 = vmatpush1.bf16.msra.mxu0 %v3388_v48  ;;  %v3471_v48 = vld [vmem:[#allocation6 + $0xa0] sm:$0xff]  }
 0x19c   :  { %2285 = vmatpush1.bf16.msra.mxu1 %v3391_v49  ;;  %2243 = vmatprep.subr.bf16.mxu0 %v3396_v51  ;;  %v3461_v49 = vld [vmem:[#allocation6 + $0x8] sm:$0xff]   ;;  %v3462_v51 = vld [vmem:[#allocation6 + $0x40] sm:$0xff]  }
 0x19d   :  { %2286 = vmatprep.subr.bf16.mxu1 %v3399_v52  ;;  %v3463_v52 = vld [vmem:[#allocation6] sm:$0xff]  }
 0x19f   :  { %2244 = vmatpush1.bf16.msra.mxu0 %v3394_v53 }
 0x1a0   :  { %2287 = vmatpush1.bf16.msra.mxu1 %v3397_v54  ;;  %2245 = vmatprep.subr.bf16.mxu0 %v3402_v55 }
 0x1a1   :  { %2288 = vmatprep.subr.bf16.mxu1 %v3405_v56  ;;  %v669_v56 = vld [vmem:[%s3719_s4] sm:$0xf] }
 0x1a3   :  { %2246 = vmatpush2.bf16.msra.mxu0 %v3400_v57 }
 0x1a4   :  { %2289 = vmatpush2.bf16.msra.mxu1 %v3403_v58  ;;  %2247 = vmatprep.subr.bf16.mxu0 %v3408_v59  ;;  %v678_v58 = vrot.slane %v669_v56, %v94_v38  ;;  %v674_v59 = vrot.slane %v669_v56, %v90_v39 }
 0x1a5   :  { %2290 = vmatprep.subr.bf16.mxu1 %v3411_v60 }
 0x1a7   :  { %2248 = vmatpush2.bf16.msra.mxu0 %v3406_v41 }
 0x1a8   :  { %2291 = vmatpush2.bf16.msra.mxu1 %v3409_v61  ;;  %2249 = vmatprep.subr.bf16.mxu0 %v3414_v62 }
 0x1a9   :  { %2292 = vmatprep.subr.bf16.mxu1 %v3417_v63 }
 0x1ab   :  { %2250 = vmatpush2.bf16.msra.mxu0 %v3412_v3 }
 0x1ac   :  { %2293 = vmatpush2.bf16.msra.mxu1 %v3415_v0  ;;  %2251 = vmatprep.subr.bf16.mxu0 %v3420_v22 }
 0x1ad   :  { %2294 = vmatprep.subr.bf16.mxu1 %v3423_v1  ;;  %v3472_v1 = vld [vmem:[#allocation6 + $0xd8] sm:$0xff]  }
 0x1af   :  { %2252 = vmatpush2.bf16.msra.mxu0 %v3418_v2 }
 0x1b0   :  { %2295 = vmatpush2.bf16.msra.mxu1 %v3421_v8  ;;  %2253 = vmatprep.subr.bf16.mxu0 %v3426_v5 }
 0x1b1   :  { %2296 = vmatprep.subr.bf16.mxu1 %v3429_v6  ;;  %v3473_v6 = vld [vmem:[#allocation6 + $0x98] sm:$0xff]  }
 0x1b3   :  { %2254 = vmatpush2.bf16.msra.mxu0 %v3424_v7 }
 0x1b4   :  { %2297 = vmatpush2.bf16.msra.mxu1 %v3427_v9  ;;  %2255 = vmatprep.subr.bf16.mxu0 %v3432_v10 }
 0x1b5   :  { %2298 = vmatprep.subr.bf16.mxu1 %v3435_v11 }
 0x1b7   :  { %2256 = vmatpush2.bf16.msra.mxu0 %v3430_v12 }
 0x1b8   :  { %2299 = vmatpush2.bf16.msra.mxu1 %v3433_v13  ;;  %2257 = vmatprep.subr.bf16.mxu0 %v3438_v15  ;;  %v3474_v13 = vld [vmem:[#allocation6 + $0xd0] sm:$0xff]  }
 0x1b9   :  { %2300 = vmatprep.subr.bf16.mxu1 %v3441_v16 }
 0x1bb   :  { %2258 = vmatpush2.bf16.msra.mxu0 %v3436_v17 }
 0x1bc   :  { %2301 = vmatpush2.bf16.msra.mxu1 %v3439_v14  ;;  %2259 = vmatprep.subr.bf16.mxu0 %v3444_v20  ;;  %v3475_v14 = vld [vmem:[#allocation6 + $0x90] sm:$0xff]  }
 0x1bd   :  { %2302 = vmatprep.subr.bf16.mxu1 %v3447_v21 }
 0x1bf   :  { %2260 = vmatpush2.bf16.msra.mxu0 %v3442_v19 }
 0x1c0   :  { %2303 = vmatpush2.bf16.msra.mxu1 %v3445_v23  ;;  %3009 = vmatprep.subr.bf16.mxu0 %v3448_v25 }
 0x1c1   :  { %3031 = vmatprep.subr.bf16.mxu1 %v3464_v31 }
 0x1c2   :  { %2262 = vmatmul.mubr.bf16.vlgmr.msra.gmra.mxu0 %v3680_v4  ;;  %v3467_v4 = vld [vmem:[#allocation6 + $0xb0] sm:$0xff]   ;;  %v2005_v53 = vpop.f32.mrf.mxu0  ;;  %v2048_v54 = vpop.f32.mrf.mxu1 }
 0x1c3   :  { %2305 = vmatmul.mubr.bf16.vlgmr.msra.gmra.mxu1 %v3682_v26  ;;  %3010 = vmatpush3.bf16.msra.mxu0 %v3449_v27  ;;  %v3457_v26 = vld [vmem:[#allocation6 + $0x18] sm:$0xff]   ;;  %v2006_v62 = vadd.f32 %v2005_v53, %v674_v59 }
 0x1c4   :  { %3011 = vmatprep.subr.bf16.mxu0 %v3450_v28  ;;  %3032 = vmatpush3.bf16.msra.mxu1 %v3465_v32  ;;  %v2007_v55 = vpop.f32.mrf.mxu0  ;;  %v2050_v57 = vpop.f32.mrf.mxu1  ;;  %v3476_v28 = vld [vmem:[#allocation6 + $0xc8] sm:$0xff]   ;;  %v3478_v32 = vld [vmem:[#allocation6 + $0xc0] sm:$0xff]  }
 0x1c5   :  { %3033 = vmatprep.subr.bf16.mxu1 %v3466_v50  ;;  %v2008_v61 = vadd.f32 %v2007_v55, %v678_v58  ;;  %v2049_v7 = vadd.f32 %v2048_v54, %v2006_v62 }
 0x1c6   :  { %v2009_v60 = vpop.f32.mrf.mxu0  ;;  %v2052_v41 = vpop.f32.mrf.mxu1 }
 0x1c7   :  { %3012 = vmatpush3.bf16.msra.mxu0 %v3451_v18  ;;  %v2010_v3 = vadd.f32 %v2009_v60, %v674_v59  ;;  %v2051_v2 = vadd.f32 %v2050_v57, %v2008_v61 }
 0x1c8   :  { %3013 = vmatprep.subr.bf16.mxu0 %v3452_v29  ;;  %3034 = vmatpush3.bf16.msra.mxu1 %v3467_v4  ;;  %v2011_v63 = vpop.f32.mrf.mxu0  ;;  %v2054_v0 = vpop.f32.mrf.mxu1  ;;  %v3477_v29 = vld [vmem:[#allocation6 + $0x88] sm:$0xff]  }
 0x1c9   :  { %3035 = vmatprep.subr.bf16.mxu1 %v3468_v34  ;;  %v2012_v8 = vadd.f32 %v2011_v63, %v678_v58  ;;  %v2053_v38 = vadd.f32 %v2052_v41, %v2010_v3 }
 0x1cb   :  { %3014 = vmatpush3.bf16.msra.mxu0 %v3453_v24  ;;  %v2055_v15 = vadd.f32 %v2054_v0, %v2012_v8 }
 0x1cc   :  { %3015 = vmatprep.subr.bf16.mxu0 %v3454_v30  ;;  %3036 = vmatpush3.bf16.msra.mxu1 %v3469_v43 }
 0x1cd   :  { %3037 = vmatprep.subr.bf16.mxu1 %v3470_v45  ;;  %v682_v45 = vrot.slane %v669_v56, %v98_v42 }
 0x1cf   :  { %3016 = vmatpush3.bf16.msra.mxu0 %v3455_v47 }
 0x1d0   :  { %3017 = vmatprep.subr.bf16.mxu0 %v3456_v33  ;;  %3038 = vmatpush3.bf16.msra.mxu1 %v3471_v48  ;;  %v3479_v33 = vld [vmem:[#allocation6 + $0x80] sm:$0xff]  }
 0x1d1   :  { %3039 = vmatprep.subr.bf16.mxu1 %v3472_v1 }
 0x1d3   :  { %3018 = vmatpush3.bf16.msra.mxu0 %v3457_v26 }
 0x1d4   :  { %3019 = vmatprep.subr.bf16.mxu0 %v3458_v35  ;;  %3040 = vmatpush3.bf16.msra.mxu1 %v3473_v6 }
 0x1d5   :  { %3041 = vmatprep.subr.bf16.mxu1 %v3474_v13 }
 0x1d7   :  { %3020 = vmatpush3.bf16.msra.mxu0 %v3459_v44  ;;  %v686_v44 = vrot.slane %v669_v56, %v102_v40 }
 0x1d8   :  { %3021 = vmatprep.subr.bf16.mxu0 %v3460_v46  ;;  %3042 = vmatpush3.bf16.msra.mxu1 %v3475_v14 }
 0x1d9   :  { %3043 = vmatprep.subr.bf16.mxu1 %v3476_v28 }
 0x1db   :  { %3022 = vmatpush3.bf16.msra.mxu0 %v3461_v49 }
 0x1dc   :  { %3023 = vmatprep.subr.bf16.mxu0 %v3462_v51  ;;  %3044 = vmatpush3.bf16.msra.mxu1 %v3477_v29 }
 0x1dd   :  { %3045 = vmatprep.subr.bf16.mxu1 %v3478_v32 }
 0x1df   :  { %3024 = vmatpush3.bf16.msra.mxu0 %v3463_v52 }
 0x1e0   :  { %3046 = vmatpush3.bf16.msra.mxu1 %v3479_v33 }
 0x202   :  { %v2091_v22 = vpop.f32.mrf.mxu0  ;;  %v2134_v5 = vpop.f32.mrf.mxu1 }
 0x203   :  { %v2092_v39 = vadd.f32 %v2091_v22, %v2049_v7 }
 0x204   :  { %v2093_v9 = vpop.f32.mrf.mxu0  ;;  %v2136_v11 = vpop.f32.mrf.mxu1 }
 0x205   :  { %v2094_v10 = vadd.f32 %v2093_v9, %v2051_v2  ;;  %v2135_v25 = vadd.f32 %v2134_v5, %v2092_v39 }
 0x206   :  { %v2095_v12 = vpop.f32.mrf.mxu0  ;;  %v2138_v17 = vpop.f32.mrf.mxu1 }
 0x207   :  { %v2096_v16 = vadd.f32 %v2095_v12, %v2053_v38  ;;  %v2137_v21 = vadd.f32 %v2136_v11, %v2094_v10  ;;  %v2315_v31 = vmax.f32 %v2135_v25, 0.0 }
 0x208   :  { %v2097_v20 = vpop.f32.mrf.mxu0  ;;  %v2140_v27 = vpop.f32.mrf.mxu1 }
 0x209   :  { %v2139_v19 = vadd.f32 %v2138_v17, %v2096_v16  ;;  %v2098_v23 = vadd.f32 %v2097_v20, %v2055_v15  ;;  %v2316_v30 = vmax.f32 %v2137_v21, 0.0  ;;  %v2976_v17 = vld [vmem:[%s3721_s6] ss:$0 sm:$0xff] }
 0x20b   :  { %v2141_v18 = vadd.f32 %v2140_v27, %v2098_v23  ;;  %v2319_v24 = vmax.f32 %v2139_v19, 0.0 }
 0x20d   :  { %v2320_v47 = vmax.f32 %v2141_v18, 0.0  ;;  %v2323_v4 = vpack.c.bf16 %v2319_v24, %v2315_v31 }
 0x20f   :  { %v2324_v50 = vpack.c.bf16 %v2320_v47, %v2316_v30 }
 0x211   :  { %2622 = vmatprep.mubr.bf16.mxu0 %v2324_v50 }
 0x212   :  { %2623 = vmatmul.mubr.bf16.vlgmr.msra.gmra.mxu0 %v2323_v4 }
 0x242   :  { %v2177_v26 = vpop.f32.mrf.mxu0 }
 0x243   :  { %v2220_v34 = vpop.f32.mrf.mxu1  ;;  %v2178_v51 = vadd.f32 %v2177_v26, %v682_v45 }
 0x244   :  { %v2179_v35 = vpop.f32.mrf.mxu0 }
 0x245   :  { %v2222_v43 = vpop.f32.mrf.mxu1  ;;  %v2180_v49 = vadd.f32 %v2179_v35, %v686_v44  ;;  %v2221_v60 = vadd.f32 %v2220_v34, %v2178_v51  ;;  %v2687_v35 = vand.u32 127, %v88_v36 }
 0x246   :  { %v2181_v46 = vpop.f32.mrf.mxu0 }
 0x247   :  { %v2224_v48 = vpop.f32.mrf.mxu1  ;;  %v2182_v53 = vadd.f32 %v2181_v46, %v682_v45  ;;  %v2223_v57 = vadd.f32 %v2222_v43, %v2180_v49  ;;  %vm2688_vm1 = vcmp.lt.s32.totalorder %v2687_v35, 13 }
 0x248   :  { %v2183_v52 = vpop.f32.mrf.mxu0 }
 0x249   :  { %v2226_v54 = vpop.f32.mrf.mxu1  ;;  %v2184_v58 = vadd.f32 %v2183_v52, %v686_v44  ;;  %v2225_v61 = vadd.f32 %v2224_v48, %v2182_v53 }
 0x24b   :  { %v2227_v37 = vadd.f32 %v2226_v54, %v2184_v58 }
 0x282   :  { %v2263_v55 = vpop.f32.mrf.mxu0 }
 0x283   :  { %v2306_v59 = vpop.f32.mrf.mxu1  ;;  %v2264_v40 = vadd.f32 %v2263_v55, %v2221_v60 }
 0x284   :  { %v2265_v41 = vpop.f32.mrf.mxu0 }
 0x285   :  { %v2266_v62 = vadd.f32 %v2265_v41, %v2223_v57  ;;  %v2308_v63 = vpop.f32.mrf.mxu1  ;;  %v2307_v8 = vadd.f32 %v2306_v59, %v2264_v40 }
 0x286   :  { %v2267_v3 = vpop.f32.mrf.mxu0 }
 0x287   :  { %v2268_v42 = vadd.f32 %v2267_v3, %v2225_v61  ;;  %v2310_v56 = vpop.f32.mrf.mxu1  ;;  %v2309_v22 = vadd.f32 %v2308_v63, %v2266_v62  ;;  %v2317_v10 = vmax.f32 %v2307_v8, 0.0 }
 0x288   :  { %v2269_v0 = vpop.f32.mrf.mxu0 }
 0x289   :  { %v2311_v1 = vadd.f32 %v2310_v56, %v2268_v42  ;;  %v2270_v2 = vadd.f32 %v2269_v0, %v2227_v37  ;;  %v2312_v5 = vpop.f32.mrf.mxu1  ;;  %v2318_v9 = vmax.f32 %v2309_v22, 0.0 }
 0x28b   :  { %v2313_v6 = vadd.f32 %v2312_v5, %v2270_v2  ;;  %v2321_v7 = vmax.f32 %v2311_v1, 0.0 }
 0x28d   :  { %v2322_v38 = vmax.f32 %v2313_v6, 0.0  ;;  %v2325_v39 = vpack.c.bf16 %v2321_v7, %v2317_v10 }
 0x28f   :  { %v2326_v11 = vpack.c.bf16 %v2322_v38, %v2318_v9 }
 0x291   :  { %2663 = vmatprep.mubr.bf16.mxu1 %v2326_v11 }
 0x292   :  { %2664 = vmatmul.mubr.bf16.vlgmr.msra.gmra.mxu1 %v2325_v39 }
 0x2d2   :  { %v3025_v12 = vpop.f32.mrf.mxu0 }
 0x2d4   :  { %v3026_v13 = vpop.f32.mrf.mxu0 }
 0x2d5   :  { %v3027_v16 = vadd.f32 %v3026_v13, %v3025_v12 }
 0x2d6   :  { %v3028_v15 = vpop.f32.mrf.mxu0 }
 0x2d7   :  { %v2625_v19 = vadd.f32 %v3027_v16, %v2976_v17 }
 0x2d8   :  { %v3029_v14 = vpop.f32.mrf.mxu0 }
 0x2d9   :  { %v3030_v23 = vadd.f32 %v3029_v14, %v3028_v15 }
 0x2db   :  { %v2628_v29 = vadd.f32 %v3030_v23, %v2976_v17 }
 0x352   :  { %v3047_v20 = vpop.f32.mrf.mxu1 }
 0x354   :  { %v3048_v21 = vpop.f32.mrf.mxu1 }
 0x355   :  { %v3049_v25 = vadd.f32 %v3048_v21, %v3047_v20 }
 0x356   :  { %v3050_v27 = vpop.f32.mrf.mxu1 }
 0x357   :  { %v2666_v28 = vadd.f32 %v3049_v25, %v2625_v19 }
 0x358   :  { %v3051_v18 = vpop.f32.mrf.mxu1 }
 0x359   :  { %v2672_v24 = vmul.f32 -0.5, %v2666_v28  ;;  %v3052_v30 = vadd.f32 %v3051_v18, %v3050_v27 }
 0x35b   :  { %v2674_v47 = vmul.f32 1.442695, %v2672_v24  ;;  %v2669_v31 = vadd.f32 %v3052_v30, %v2628_v29 }
 0x35d   :  { %3480 = vpow2.f32 %v2674_v47  ;;  %v2673_v32 = vmul.f32 -0.5, %v2669_v31 }
 0x35f   :  { %v2676_v50 = vmul.f32 1.442695, %v2673_v32 }
 0x361   :  { %3482 = vpow2.f32 %v2676_v50 }
 0x36a   :  { %v3481_v33 = vpop.eup %3480 }
 0x36b   :  { %v2678_v4 = vadd.f32 1.0, %v3481_v33 }
 0x36d   :  { %3484 = vrcp.f32 %v2678_v4 }
 0x36e   :  { %v3483_v26 = vpop.eup %3482 }
 0x36f   :  { %v2679_v34 = vadd.f32 1.0, %v3483_v26 }
 0x371   :  { %3486 = vrcp.f32 %v2679_v34 }
 0x37a   :  { %v3485_v43 = vpop.eup %3484 }
 0x37b   :  { %v2682_v44 = vmul.f32 1.4999, %v3485_v43 }
 0x37d   :  { %v2684_v45 = vadd.f32 0.0001, %v2682_v44 }
 0x37e   :  { %v3487_v46 = vpop.eup %3486 }
 0x37f   :  { %v2689_v48 = vsel %vm2688_vm1, %v2666_v28, %v2684_v45  ;;  %v2683_v49 = vmul.f32 1.4999, %v3487_v46 }
 0x380   :  { %2691 = vst [vmem:[%s3722_s7] sm:$0xff] %v2689_v48 }
 0x381   :  { %v2685_v51 = vadd.f32 0.0001, %v2683_v49 }
 0x383   :  { %v2690_v52 = vsel %vm2688_vm1, %v2669_v31, %v2685_v51 }
 0x384   :  { %2692 = vst [vmem:[%s3722_s7 + $0x8] sm:$0xff] %v2690_v52 }
 0x385   :  { %2697 = vsyncpa [#allocation3], 1 }
 0x386   :  { %2698 = vsyncpa [#allocation5], 1 }

</bundles_post_ra>
